<compile_context>
chip_gen: v7x
topology: tpu7x:2x2x1
jax: 0.10.0
libtpu: 0.0.40
codegen_flags: <defaults>
</compile_context>

<pallas_src>
import functools

import jax
import jax.numpy as jnp
from jax.experimental import pallas as pl
from jax.experimental.pallas import tpu as pltpu

_EPS = 1e-5


# ---------------------------------------------------------------------------
# Fused multiscale Pallas kernel (both units in one call)
# ---------------------------------------------------------------------------

def _compute_unit(x2, bg_ref, sg_ref, wt_ref, st_ref, wd_ref, sd_ref,
                  o_ref, g_pad_ref, ic_ref, *, T, V, Cout, kt, stride, pad, t_out):
    """One TCN_GCN_unit forward for one sample (x2 is the (T, V*C_in) bf16 activation)."""
    VCout = V * Cout

    # ---- GCN: sum_k conv1x1_k(x @ A_k) + folded BN + ReLU as ONE deep matmul ----
    g = jnp.dot(x2, bg_ref[...], preferred_element_type=jnp.float32)   # (T, V*Cout) f32
    g = jnp.maximum(g + sg_ref[...], 0.0)

    # Temporal zero padding handled fully in VMEM.
    if pad > 0:
        zrow = jnp.zeros((pad, VCout), g_pad_ref.dtype)
        g_pad_ref[pl.ds(0, pad), :] = zrow
        g_pad_ref[pl.ds(pad + T, pad), :] = zrow
    g_pad_ref[pl.ds(pad, T), :] = g.astype(g_pad_ref.dtype)

    # ---- TCN (Unit2D): im2col along T, then ONE (kt*V*Cout)-deep matmul ----
    for dt in range(kt):                                               # static unroll
        if stride == 1:
            blk = g_pad_ref[pl.ds(dt, t_out), :]
        else:
            # TODO(synk): stride > 1 temporal path implemented but not exercised here.
            blk = g_pad_ref[pl.ds(dt, t_out, stride), :]
        ic_ref[:, pl.ds(dt * VCout, VCout)] = blk                      # 128-aligned store
    y = jnp.dot(ic_ref[...], wt_ref[...], preferred_element_type=jnp.float32)
    y = jnp.maximum(y + st_ref[...], 0.0)                              # (t_out, V*Cout) f32

    # ---- residual / down path (fused; no host-side add) ----
    if wd_ref is not None:
        if stride == 1:
            xr = x2
        else:
            # TODO(synk): strided down path implemented but not exercised (stride == 1 here).
            xr = jax.lax.slice(x2, (0, 0),
                               ((t_out - 1) * stride + 1, x2.shape[1]), (stride, 1))
        r = jnp.dot(xr, wd_ref[...], preferred_element_type=jnp.float32)
        r = jnp.maximum(r + sd_ref[...], 0.0)
    else:
        # identity residual (C_in == Cout, stride == 1); v-major layout matches the output
        r = x2.astype(jnp.float32)

    o_ref[0] = y + r


def _multiscale_kernel(*refs, T, V, units):
    """refs = (x, [Bg, shift_g, Wt, shift_t, (Wd, shift_d)] per unit,
               out per unit, (g_pad, ic) scratch per unit)."""
    it = iter(refs)
    x_ref = next(it)
    weights = []
    for u in units:
        bg, sg, wt, st = next(it), next(it), next(it), next(it)
        if u["has_down"]:
            wd, sd = next(it), next(it)
        else:
            wd = sd = None
        weights.append((bg, sg, wt, st, wd, sd))
    outs = [next(it) for _ in units]
    scratches = [(next(it), next(it)) for _ in units]

    x2 = x_ref[0]                                                      # (T, V*C_in) bf16
    for u, w, o_ref, (g_pad_ref, ic_ref) in zip(units, weights, outs, scratches):
        _compute_unit(x2, *w, o_ref, g_pad_ref, ic_ref,
                      T=T, V=V, Cout=u["Cout"], kt=u["kt"],
                      stride=u["stride"], pad=u["pad"], t_out=u["t_out"])


def _multiscale_fused_call(x_flat, fps):
    """x_flat: (N, T, V*C_in) bf16  ->  tuple of (N, t_out, V*Cout_i) f32, lane-dense."""
    N, T, VC_in = x_flat.shape
    V = fps[0]["V"]

    units, operands, in_specs = [], [x_flat], [pl.BlockSpec((1, T, VC_in), lambda n: (n, 0, 0))]
    out_shapes, out_specs, scratch_shapes = [], [], []

    for fp in fps:
        Cout, kt, stride = fp["Cout"], fp["kt"], fp["stride"]
        VCout = V * Cout
        pad = (kt - 1) // 2
        T_pad = T + 2 * pad
        t_out = (T_pad - kt) // stride + 1
        has_down = fp["Wd"] is not None
        units.append(dict(Cout=Cout, kt=kt, stride=stride, pad=pad,
                          t_out=t_out, has_down=has_down))

        operands += [fp["Bg"], fp["shift_g"], fp["Wt"], fp["shift_t"]]
        in_specs += [
            pl.BlockSpec((VC_in, VCout), lambda n: (0, 0)),
            pl.BlockSpec((1, VCout), lambda n: (0, 0)),
            pl.BlockSpec((kt * VCout, VCout), lambda n: (0, 0)),
            pl.BlockSpec((1, VCout), lambda n: (0, 0)),
        ]
        if has_down:
            operands += [fp["Wd"], fp["shift_d"]]
            in_specs += [
                pl.BlockSpec((VC_in, VCout), lambda n: (0, 0)),
                pl.BlockSpec((1, VCout), lambda n: (0, 0)),
            ]

        out_shapes.append(jax.ShapeDtypeStruct((N, t_out, VCout), jnp.float32))
        out_specs.append(pl.BlockSpec((1, t_out, VCout), lambda n: (n, 0, 0)))
        scratch_shapes += [
            pltpu.VMEM((T_pad, VCout), jnp.bfloat16),                 # temporal zero-pad slab
            pltpu.VMEM((t_out, kt * VCout), jnp.bfloat16),            # im2col slab
        ]

    kern = functools.partial(_multiscale_kernel, T=T, V=V, units=tuple(units))

    # All operands + scratch are ~1 MB total, far under the default scoped-VMEM limit.
    return pl.pallas_call(
        kern,
        out_shape=tuple(out_shapes),
        grid=(N,),
        in_specs=in_specs,
        out_specs=tuple(out_specs),
        scratch_shapes=scratch_shapes,
        compiler_params=pltpu.CompilerParams(dimension_semantics=("parallel",)),
    )(*operands)


# ---------------------------------------------------------------------------
# Parameters (deterministic, synthetic) and trace-time weight fusion
# ---------------------------------------------------------------------------

def _bn_params(key, c):
    k1, k2, k3, k4 = jax.random.split(key, 4)
    gamma = 1.0 + 0.1 * jax.random.normal(k1, (c,), jnp.float32)
    beta = 0.05 * jax.random.normal(k2, (c,), jnp.float32)
    mean = 0.05 * jax.random.normal(k3, (c,), jnp.float32)
    var = 1.0 + 0.1 * jax.random.uniform(k4, (c,), jnp.float32)
    return gamma, beta, mean, var


def make_unit_params(key, c_in, c_out, A, kernel_size, stride):
    """Raw parameters for one TCN_GCN_unit (unit_agcn + Unit2D [+ down Unit2D])."""
    K = A.shape[0]
    keys = jax.random.split(key, 9)
    p = {"A": A, "kernel_size": kernel_size, "stride": stride}
    p["gcn_w"] = 0.2 * jax.random.normal(keys[0], (K, c_in, c_out), jnp.float32)
    p["gcn_b"] = 0.05 * jax.random.normal(keys[1], (c_out,), jnp.float32)
    p["gcn_bn"] = _bn_params(keys[2], c_out)
    p["tcn_w"] = (0.2 / kernel_size) * jax.random.normal(
        keys[3], (kernel_size, c_out, c_out), jnp.float32)
    p["tcn_b"] = 0.05 * jax.random.normal(keys[4], (c_out,), jnp.float32)
    p["tcn_bn"] = _bn_params(keys[5], c_out)
    if c_in != c_out or stride != 1:
        p["down_w"] = 0.2 * jax.random.normal(keys[6], (1, c_in, c_out), jnp.float32)
        p["down_b"] = 0.05 * jax.random.normal(keys[7], (c_out,), jnp.float32)
        p["down_bn"] = _bn_params(keys[8], c_out)
    else:
        p["down_w"] = None
    return p


def build_fused_params(p, V, c_in, c_out):
    """Fold BN scale into weights; build the kron-expanded, bf16, v-major matmul operands."""
    A = p["A"]
    kt, stride = p["kernel_size"], p["stride"]
    eyeV = jnp.eye(V, dtype=jnp.float32)

    def fold(bias, bn):
        gamma, beta, mean, var = bn
        scale = gamma / jnp.sqrt(var + _EPS)
        shift = beta + (bias - mean) * scale
        return scale, jnp.tile(shift, V).reshape(1, V * c_out)        # per-channel, tiled over V

    # GCN: Bg[(v,c),(w,d)] = sum_k A_k[v,w] * gcn_w[k,c,d], BN scale folded into d.
    g_scale, shift_g = fold(p["gcn_b"], p["gcn_bn"])
    Bg = jnp.einsum("kcd,kvw->vcwd", p["gcn_w"], A) * g_scale
    Bg = Bg.reshape(V * c_in, V * c_out)

    # TCN: Wt[(dt,v,c),(w,d)] = I_V[v,w] * tcn_w[dt,c,d] * scale[d]
    t_scale, shift_t = fold(p["tcn_b"], p["tcn_bn"])
    Wt = jnp.einsum("vw,tcd->tvcwd", eyeV, p["tcn_w"] * t_scale)
    Wt = Wt.reshape(kt * V * c_out, V * c_out)

    if p["down_w"] is not None:
        d_scale, shift_d = fold(p["down_b"], p["down_bn"])
        Wd = jnp.einsum("vw,cd->vcwd", eyeV, p["down_w"][0] * d_scale)
        Wd = Wd.reshape(V * c_in, V * c_out).astype(jnp.bfloat16)
    else:
        Wd, shift_d = None, None

    return {
        "Bg": Bg.astype(jnp.bfloat16), "shift_g": shift_g,
        "Wt": Wt.astype(jnp.bfloat16), "shift_t": shift_t,
        "Wd": Wd, "shift_d": shift_d,
        "V": V, "C_in": c_in, "Cout": c_out, "kt": kt, "stride": stride,
    }


# ---------------------------------------------------------------------------
# Forward
# ---------------------------------------------------------------------------

def tcn_gcn_unit_multiscale_forward(x_nctv, fp1, fp2):
    """x: (N, C_in, T, V) NCHW  ->  (N, C_out, Tout, V)  (matches torch.cat(dim=1))."""
    N, C_in, T, V = x_nctv.shape
    # Single input-sized relayout NCTV -> (N, T, V*C) (v-major, shared by both units);
    # the kernel never materializes the K-fold intermediate or any inter-stage HBM tensor.
    x_flat = jnp.transpose(x_nctv, (0, 2, 3, 1)).reshape(N, T, V * C_in)
    x_flat = x_flat.astype(jnp.bfloat16)

    y1, y2 = _multiscale_fused_call(x_flat, (fp1, fp2))   # lane-dense (N, Tout, V*C_i) f32

    Tout = y1.shape[1]
    y1 = y1.reshape(N, Tout, V, fp1["Cout"])
    y2 = y2.reshape(N, Tout, V, fp2["Cout"])
    y = jnp.concatenate([y1, y2], axis=-1)                # channel concat == torch.cat(dim=1)
    return jnp.transpose(y, (0, 3, 1, 2))                 # back to NCHW on the tiny output


# ---------------------------------------------------------------------------
# Pure-JAX f32 reference (unfused) for a correctness check
# ---------------------------------------------------------------------------

def _unit_ref(x_nctv, p):
    A = p["A"]
    kt, s = p["kernel_size"], p["stride"]
    pad = (kt - 1) // 2

    def bn(y, bias, params):
        gamma, beta, mean, var = params
        return (y + bias - mean) * (gamma / jnp.sqrt(var + _EPS)) + beta

    xa = jnp.einsum("nctv,kvw->nktwc", x_nctv, A)
    g = jnp.einsum("nktwc,kcd->ntwd", xa, p["gcn_w"])
    g = jnp.maximum(bn(g, p["gcn_b"], p["gcn_bn"]), 0.0)              # (N, T, V, Cout)

    gp = jnp.pad(g, ((0, 0), (pad, pad), (0, 0), (0, 0)))
    t_out = (g.shape[1] + 2 * pad - kt) // s + 1
    acc = jnp.zeros((g.shape[0], t_out, g.shape[2], g.shape[3]), jnp.float32)
    for dt in range(kt):
        acc = acc + jnp.einsum("ntvc,cd->ntvd",
                               gp[:, dt:dt + (t_out - 1) * s + 1:s], p["tcn_w"][dt])
    t_val = jnp.maximum(bn(acc, p["tcn_b"], p["tcn_bn"]), 0.0)

    x_ntvc = jnp.transpose(x_nctv, (0, 2, 3, 1))
    if p["down_w"] is not None:
        r = jnp.einsum("ntvc,cd->ntvd", x_ntvc[:, ::s], p["down_w"][0])
        r = jnp.maximum(bn(r, p["down_b"], p["down_bn"]), 0.0)
    else:
        r = x_ntvc[:, ::s]
    return t_val + r


def multiscale_ref(x_nctv, p1, p2):
    y = jnp.concatenate([_unit_ref(x_nctv, p1), _unit_ref(x_nctv, p2)], axis=-1)
    return jnp.transpose(y, (0, 3, 1, 2))


# ---------------------------------------------------------------------------

if __name__ == "__main__":
    key = jax.random.PRNGKey(0)
    N, C_IN, T, V = 2, 4, 16, 16            # NCHW input (N, C, T=frames, V=joints)
    OUT_CHANNELS = 16
    K_SUBSETS = 3
    KERNEL_SIZE = 9
    STRIDE = 1

    k_a, k_x, k_1, k_2 = jax.random.split(key, 4)
    A = 0.3 * jax.random.uniform(k_a, (K_SUBSETS, V, V), jnp.float32)
    x = jax.random.normal(k_x, (N, C_IN, T, V), jnp.float32)

    c1 = OUT_CHANNELS // 2                  # unit_1 out channels
    c2 = OUT_CHANNELS - OUT_CHANNELS // 2   # unit_2 out channels
    p1 = make_unit_params(k_1, C_IN, c1, A, kernel_size=KERNEL_SIZE, stride=STRIDE)
    p2 = make_unit_params(k_2, C_IN, c2, A, kernel_size=KERNEL_SIZE * 2 - 1, stride=STRIDE)
    fp1 = build_fused_params(p1, V, C_IN, c1)
    fp2 = build_fused_params(p2, V, C_IN, c2)

    fwd = jax.jit(lambda xi: tcn_gcn_unit_multiscale_forward(xi, fp1, fp2))
    y = fwd(x)
    jax.block_until_ready(y)

    assert y.shape == (N, OUT_CHANNELS, T, V), y.shape
    assert bool(jnp.all(jnp.isfinite(y)))

    # correctness vs. unfused f32 reference (loose tolerance: bf16 matmul operands)
    y_ref = multiscale_ref(x, p1, p2)
    max_err = float(jnp.max(jnp.abs(y - y_ref)))
    assert max_err < 0.15, max_err

    print("KERNEL_OK")
</pallas_src>

<mosaic_0001>
module attributes {stable_mosaic.version = 11 : i64} {
  func.func @_multiscale_kernel(%arg0: i32, %arg1: memref<1x16x64xbf16, #tpu.memory_space<vmem>>, %arg2: memref<64x128xbf16, #tpu.memory_space<vmem>>, %arg3: memref<1x128xf32, #tpu.memory_space<vmem>>, %arg4: memref<1152x128xbf16, #tpu.memory_space<vmem>>, %arg5: memref<1x128xf32, #tpu.memory_space<vmem>>, %arg6: memref<64x128xbf16, #tpu.memory_space<vmem>>, %arg7: memref<1x128xf32, #tpu.memory_space<vmem>>, %arg8: memref<64x128xbf16, #tpu.memory_space<vmem>>, %arg9: memref<1x128xf32, #tpu.memory_space<vmem>>, %arg10: memref<2176x128xbf16, #tpu.memory_space<vmem>>, %arg11: memref<1x128xf32, #tpu.memory_space<vmem>>, %arg12: memref<64x128xbf16, #tpu.memory_space<vmem>>, %arg13: memref<1x128xf32, #tpu.memory_space<vmem>>, %arg14: memref<1x16x128xf32, #tpu.memory_space<vmem>>, %arg15: memref<1x16x128xf32, #tpu.memory_space<vmem>>, %arg16: memref<24x128xbf16, #tpu.memory_space<vmem>>, %arg17: memref<16x1152xbf16, #tpu.memory_space<vmem>>, %arg18: memref<32x128xbf16, #tpu.memory_space<vmem>>, %arg19: memref<16x2176xbf16, #tpu.memory_space<vmem>>) attributes {dimension_semantics = [#tpu.dimension_semantics<parallel>], iteration_bounds = array<i64: 2>, scalar_prefetch = 0 : i64, scratch_operands = 4 : i64, tpu.core_type = #tpu.core_type<tc>, window_params = [{transform_indices = @transform_0, window_bounds = array<i64: 1, 16, 64>}, {pipeline_mode = #tpu.pipeline_mode<synchronous>, transform_indices = @transform_1, window_bounds = array<i64: 64, 128>}, {pipeline_mode = #tpu.pipeline_mode<synchronous>, transform_indices = @transform_2, window_bounds = array<i64: 1, 128>}, {pipeline_mode = #tpu.pipeline_mode<synchronous>, transform_indices = @transform_3, window_bounds = array<i64: 1152, 128>}, {pipeline_mode = #tpu.pipeline_mode<synchronous>, transform_indices = @transform_4, window_bounds = array<i64: 1, 128>}, {pipeline_mode = #tpu.pipeline_mode<synchronous>, transform_indices = @transform_5, window_bounds = array<i64: 64, 128>}, {pipeline_mode = #tpu.pipeline_mode<synchronous>, transform_indices = @transform_6, window_bounds = array<i64: 1, 128>}, {pipeline_mode = #tpu.pipeline_mode<synchronous>, transform_indices = @transform_7, window_bounds = array<i64: 64, 128>}, {pipeline_mode = #tpu.pipeline_mode<synchronous>, transform_indices = @transform_8, window_bounds = array<i64: 1, 128>}, {pipeline_mode = #tpu.pipeline_mode<synchronous>, transform_indices = @transform_9, window_bounds = array<i64: 2176, 128>}, {pipeline_mode = #tpu.pipeline_mode<synchronous>, transform_indices = @transform_10, window_bounds = array<i64: 1, 128>}, {pipeline_mode = #tpu.pipeline_mode<synchronous>, transform_indices = @transform_11, window_bounds = array<i64: 64, 128>}, {pipeline_mode = #tpu.pipeline_mode<synchronous>, transform_indices = @transform_12, window_bounds = array<i64: 1, 128>}, {transform_indices = @transform_13, window_bounds = array<i64: 1, 16, 128>}, {transform_indices = @transform_14, window_bounds = array<i64: 1, 16, 128>}]} {
    %c0 = arith.constant 0 : index
    %c0_0 = arith.constant 0 : index
    %c0_1 = arith.constant 0 : index
    %0 = vector.load %arg1[%c0, %c0_0, %c0_1] : memref<1x16x64xbf16, #tpu.memory_space<vmem>>, vector<1x16x64xbf16>
    %1 = vector.shape_cast %0 : vector<1x16x64xbf16> to vector<16x64xbf16>
    %c0_2 = arith.constant 0 : index
    %c0_3 = arith.constant 0 : index
    %2 = vector.load %arg2[%c0_2, %c0_3] : memref<64x128xbf16, #tpu.memory_space<vmem>>, vector<64x128xbf16>
    %cst = arith.constant dense<0.000000e+00> : vector<16x128xf32>
    %3 = tpu.matmul %1, %2, %cst {dimension_numbers = #tpu.dot_dimension_numbers<[1], [0], [0], [1], [0, 0, 1, 1], [], []>} : vector<16x64xbf16>, vector<64x128xbf16>, vector<16x128xf32> -> vector<16x128xf32>
    %c0_4 = arith.constant 0 : index
    %c0_5 = arith.constant 0 : index
    %4 = vector.load %arg3[%c0_4, %c0_5] : memref<1x128xf32, #tpu.memory_space<vmem>>, vector<1x128xf32>
    %5 = vector.broadcast %4 : vector<1x128xf32> to vector<16x128xf32>
    %6 = arith.addf %3, %5 : vector<16x128xf32>
    %cst_6 = arith.constant 0.000000e+00 : f32
    %7 = vector.broadcast %cst_6 : f32 to vector<16x128xf32>
    %8 = arith.maximumf %6, %7 : vector<16x128xf32>
    %cst_7 = arith.constant 0.000000e+00 : bf16
    %9 = vector.broadcast %cst_7 : bf16 to vector<4x128xbf16>
    %c0_8 = arith.constant 0 : index
    %c0_9 = arith.constant 0 : index
    %10 = vector.load %arg16[%c0_8, %c0_9] : memref<24x128xbf16, #tpu.memory_space<vmem>>, vector<4x128xbf16>
    tpu.vector_store %arg16[%c0_8, %c0_9], %9 {strides = array<i32>} : memref<24x128xbf16, #tpu.memory_space<vmem>>, vector<4x128xbf16>,
    %c20 = arith.constant 20 : index
    %c0_10 = arith.constant 0 : index
    %11 = vector.load %arg16[%c20, %c0_10] : memref<24x128xbf16, #tpu.memory_space<vmem>>, vector<4x128xbf16>
    tpu.vector_store %arg16[%c20, %c0_10], %9 {strides = array<i32>} : memref<24x128xbf16, #tpu.memory_space<vmem>>, vector<4x128xbf16>,
    %12 = arith.truncf %8 : vector<16x128xf32> to vector<16x128xbf16>
    %c4 = arith.constant 4 : index
    %c0_11 = arith.constant 0 : index
    %13 = vector.load %arg16[%c4, %c0_11] : memref<24x128xbf16, #tpu.memory_space<vmem>>, vector<16x128xbf16>
    tpu.vector_store %arg16[%c4, %c0_11], %12 {strides = array<i32>} : memref<24x128xbf16, #tpu.memory_space<vmem>>, vector<16x128xbf16>,
    %c0_12 = arith.constant 0 : index
    %c0_13 = arith.constant 0 : index
    %14 = vector.load %arg16[%c0_12, %c0_13] : memref<24x128xbf16, #tpu.memory_space<vmem>>, vector<16x128xbf16>
    %c0_14 = arith.constant 0 : index
    %c0_15 = arith.constant 0 : index
    %15 = vector.load %arg17[%c0_14, %c0_15] : memref<16x1152xbf16, #tpu.memory_space<vmem>>, vector<16x128xbf16>
    tpu.vector_store %arg17[%c0_14, %c0_15], %14 {strides = array<i32>} : memref<16x1152xbf16, #tpu.memory_space<vmem>>, vector<16x128xbf16>,
    %c1 = arith.constant 1 : index
    %c0_16 = arith.constant 0 : index
    %16 = vector.load %arg16[%c1, %c0_16] : memref<24x128xbf16, #tpu.memory_space<vmem>>, vector<16x128xbf16>
    %c0_17 = arith.constant 0 : index
    %c128 = arith.constant 128 : index
    %17 = vector.load %arg17[%c0_17, %c128] : memref<16x1152xbf16, #tpu.memory_space<vmem>>, vector<16x128xbf16>
    tpu.vector_store %arg17[%c0_17, %c128], %16 {strides = array<i32>} : memref<16x1152xbf16, #tpu.memory_space<vmem>>, vector<16x128xbf16>,
    %c2 = arith.constant 2 : index
    %c0_18 = arith.constant 0 : index
    %18 = vector.load %arg16[%c2, %c0_18] : memref<24x128xbf16, #tpu.memory_space<vmem>>, vector<16x128xbf16>
    %c0_19 = arith.constant 0 : index
    %c256 = arith.constant 256 : index
    %19 = vector.load %arg17[%c0_19, %c256] : memref<16x1152xbf16, #tpu.memory_space<vmem>>, vector<16x128xbf16>
    tpu.vector_store %arg17[%c0_19, %c256], %18 {strides = array<i32>} : memref<16x1152xbf16, #tpu.memory_space<vmem>>, vector<16x128xbf16>,
    %c3 = arith.constant 3 : index
    %c0_20 = arith.constant 0 : index
    %20 = vector.load %arg16[%c3, %c0_20] : memref<24x128xbf16, #tpu.memory_space<vmem>>, vector<16x128xbf16>
    %c0_21 = arith.constant 0 : index
    %c384 = arith.constant 384 : index
    %21 = vector.load %arg17[%c0_21, %c384] : memref<16x1152xbf16, #tpu.memory_space<vmem>>, vector<16x128xbf16>
    tpu.vector_store %arg17[%c0_21, %c384], %20 {strides = array<i32>} : memref<16x1152xbf16, #tpu.memory_space<vmem>>, vector<16x128xbf16>,
    %c4_22 = arith.constant 4 : index
    %c0_23 = arith.constant 0 : index
    %22 = vector.load %arg16[%c4_22, %c0_23] : memref<24x128xbf16, #tpu.memory_space<vmem>>, vector<16x128xbf16>
    %c0_24 = arith.constant 0 : index
    %c512 = arith.constant 512 : index
    %23 = vector.load %arg17[%c0_24, %c512] : memref<16x1152xbf16, #tpu.memory_space<vmem>>, vector<16x128xbf16>
    tpu.vector_store %arg17[%c0_24, %c512], %22 {strides = array<i32>} : memref<16x1152xbf16, #tpu.memory_space<vmem>>, vector<16x128xbf16>,
    %c5 = arith.constant 5 : index
    %c0_25 = arith.constant 0 : index
    %24 = vector.load %arg16[%c5, %c0_25] : memref<24x128xbf16, #tpu.memory_space<vmem>>, vector<16x128xbf16>
    %c0_26 = arith.constant 0 : index
    %c640 = arith.constant 640 : index
    %25 = vector.load %arg17[%c0_26, %c640] : memref<16x1152xbf16, #tpu.memory_space<vmem>>, vector<16x128xbf16>
    tpu.vector_store %arg17[%c0_26, %c640], %24 {strides = array<i32>} : memref<16x1152xbf16, #tpu.memory_space<vmem>>, vector<16x128xbf16>,
    %c6 = arith.constant 6 : index
    %c0_27 = arith.constant 0 : index
    %26 = vector.load %arg16[%c6, %c0_27] : memref<24x128xbf16, #tpu.memory_space<vmem>>, vector<16x128xbf16>
    %c0_28 = arith.constant 0 : index
    %c768 = arith.constant 768 : index
    %27 = vector.load %arg17[%c0_28, %c768] : memref<16x1152xbf16, #tpu.memory_space<vmem>>, vector<16x128xbf16>
    tpu.vector_store %arg17[%c0_28, %c768], %26 {strides = array<i32>} : memref<16x1152xbf16, #tpu.memory_space<vmem>>, vector<16x128xbf16>,
    %c7 = arith.constant 7 : index
    %c0_29 = arith.constant 0 : index
    %28 = vector.load %arg16[%c7, %c0_29] : memref<24x128xbf16, #tpu.memory_space<vmem>>, vector<16x128xbf16>
    %c0_30 = arith.constant 0 : index
    %c896 = arith.constant 896 : index
    %29 = vector.load %arg17[%c0_30, %c896] : memref<16x1152xbf16, #tpu.memory_space<vmem>>, vector<16x128xbf16>
    tpu.vector_store %arg17[%c0_30, %c896], %28 {strides = array<i32>} : memref<16x1152xbf16, #tpu.memory_space<vmem>>, vector<16x128xbf16>,
    %c8 = arith.constant 8 : index
    %c0_31 = arith.constant 0 : index
    %30 = vector.load %arg16[%c8, %c0_31] : memref<24x128xbf16, #tpu.memory_space<vmem>>, vector<16x128xbf16>
    %c0_32 = arith.constant 0 : index
    %c1024 = arith.constant 1024 : index
    %31 = vector.load %arg17[%c0_32, %c1024] : memref<16x1152xbf16, #tpu.memory_space<vmem>>, vector<16x128xbf16>
    tpu.vector_store %arg17[%c0_32, %c1024], %30 {strides = array<i32>} : memref<16x1152xbf16, #tpu.memory_space<vmem>>, vector<16x128xbf16>,
    %c0_33 = arith.constant 0 : index
    %c0_34 = arith.constant 0 : index
    %32 = vector.load %arg17[%c0_33, %c0_34] : memref<16x1152xbf16, #tpu.memory_space<vmem>>, vector<16x1152xbf16>
    %c0_35 = arith.constant 0 : index
    %c0_36 = arith.constant 0 : index
    %33 = vector.load %arg4[%c0_35, %c0_36] : memref<1152x128xbf16, #tpu.memory_space<vmem>>, vector<1152x128xbf16>
    %cst_37 = arith.constant dense<0.000000e+00> : vector<16x128xf32>
    %34 = tpu.matmul %32, %33, %cst_37 {dimension_numbers = #tpu.dot_dimension_numbers<[1], [0], [0], [1], [0, 0, 1, 1], [], []>} : vector<16x1152xbf16>, vector<1152x128xbf16>, vector<16x128xf32> -> vector<16x128xf32>
    %c0_38 = arith.constant 0 : index
    %c0_39 = arith.constant 0 : index
    %35 = vector.load %arg5[%c0_38, %c0_39] : memref<1x128xf32, #tpu.memory_space<vmem>>, vector<1x128xf32>
    %36 = vector.broadcast %35 : vector<1x128xf32> to vector<16x128xf32>
    %37 = arith.addf %34, %36 : vector<16x128xf32>
    %cst_40 = arith.constant 0.000000e+00 : f32
    %38 = vector.broadcast %cst_40 : f32 to vector<16x128xf32>
    %39 = arith.maximumf %37, %38 : vector<16x128xf32>
    %c0_41 = arith.constant 0 : index
    %c0_42 = arith.constant 0 : index
    %40 = vector.load %arg6[%c0_41, %c0_42] : memref<64x128xbf16, #tpu.memory_space<vmem>>, vector<64x128xbf16>
    %cst_43 = arith.constant dense<0.000000e+00> : vector<16x128xf32>
    %41 = tpu.matmul %1, %40, %cst_43 {dimension_numbers = #tpu.dot_dimension_numbers<[1], [0], [0], [1], [0, 0, 1, 1], [], []>} : vector<16x64xbf16>, vector<64x128xbf16>, vector<16x128xf32> -> vector<16x128xf32>
    %c0_44 = arith.constant 0 : index
    %c0_45 = arith.constant 0 : index
    %42 = vector.load %arg7[%c0_44, %c0_45] : memref<1x128xf32, #tpu.memory_space<vmem>>, vector<1x128xf32>
    %43 = vector.broadcast %42 : vector<1x128xf32> to vector<16x128xf32>
    %44 = arith.addf %41, %43 : vector<16x128xf32>
    %cst_46 = arith.constant 0.000000e+00 : f32
    %45 = vector.broadcast %cst_46 : f32 to vector<16x128xf32>
    %46 = arith.maximumf %44, %45 : vector<16x128xf32>
    %47 = arith.addf %39, %46 : vector<16x128xf32>
    %c0_47 = arith.constant 0 : index
    %c0_48 = arith.constant 0 : index
    %c0_49 = arith.constant 0 : index
    %48 = vector.load %arg14[%c0_47, %c0_48, %c0_49] : memref<1x16x128xf32, #tpu.memory_space<vmem>>, vector<1x16x128xf32>
    %49 = vector.shape_cast %48 : vector<1x16x128xf32> to vector<16x128xf32>
    %50 = vector.shape_cast %47 : vector<16x128xf32> to vector<1x16x128xf32>
    tpu.vector_store %arg14[%c0_47, %c0_48, %c0_49], %50 {strides = array<i32>} : memref<1x16x128xf32, #tpu.memory_space<vmem>>, vector<1x16x128xf32>,
    %c0_50 = arith.constant 0 : index
    %c0_51 = arith.constant 0 : index
    %51 = vector.load %arg8[%c0_50, %c0_51] : memref<64x128xbf16, #tpu.memory_space<vmem>>, vector<64x128xbf16>
    %cst_52 = arith.constant dense<0.000000e+00> : vector<16x128xf32>
    %52 = tpu.matmul %1, %51, %cst_52 {dimension_numbers = #tpu.dot_dimension_numbers<[1], [0], [0], [1], [0, 0, 1, 1], [], []>} : vector<16x64xbf16>, vector<64x128xbf16>, vector<16x128xf32> -> vector<16x128xf32>
    %c0_53 = arith.constant 0 : index
    %c0_54 = arith.constant 0 : index
    %53 = vector.load %arg9[%c0_53, %c0_54] : memref<1x128xf32, #tpu.memory_space<vmem>>, vector<1x128xf32>
    %54 = vector.broadcast %53 : vector<1x128xf32> to vector<16x128xf32>
    %55 = arith.addf %52, %54 : vector<16x128xf32>
    %cst_55 = arith.constant 0.000000e+00 : f32
    %56 = vector.broadcast %cst_55 : f32 to vector<16x128xf32>
    %57 = arith.maximumf %55, %56 : vector<16x128xf32>
    %cst_56 = arith.constant 0.000000e+00 : bf16
    %58 = vector.broadcast %cst_56 : bf16 to vector<8x128xbf16>
    %c0_57 = arith.constant 0 : index
    %c0_58 = arith.constant 0 : index
    %59 = vector.load %arg18[%c0_57, %c0_58] : memref<32x128xbf16, #tpu.memory_space<vmem>>, vector<8x128xbf16>
    tpu.vector_store %arg18[%c0_57, %c0_58], %58 {strides = array<i32>} : memref<32x128xbf16, #tpu.memory_space<vmem>>, vector<8x128xbf16>,
    %c24 = arith.constant 24 : index
    %c0_59 = arith.constant 0 : index
    %60 = vector.load %arg18[%c24, %c0_59] : memref<32x128xbf16, #tpu.memory_space<vmem>>, vector<8x128xbf16>
    tpu.vector_store %arg18[%c24, %c0_59], %58 {strides = array<i32>} : memref<32x128xbf16, #tpu.memory_space<vmem>>, vector<8x128xbf16>,
    %61 = arith.truncf %57 : vector<16x128xf32> to vector<16x128xbf16>
    %c8_60 = arith.constant 8 : index
    %c0_61 = arith.constant 0 : index
    %62 = vector.load %arg18[%c8_60, %c0_61] : memref<32x128xbf16, #tpu.memory_space<vmem>>, vector<16x128xbf16>
    tpu.vector_store %arg18[%c8_60, %c0_61], %61 {strides = array<i32>} : memref<32x128xbf16, #tpu.memory_space<vmem>>, vector<16x128xbf16>,
    %c0_62 = arith.constant 0 : index
    %c0_63 = arith.constant 0 : index
    %63 = vector.load %arg18[%c0_62, %c0_63] : memref<32x128xbf16, #tpu.memory_space<vmem>>, vector<16x128xbf16>
    %c0_64 = arith.constant 0 : index
    %c0_65 = arith.constant 0 : index
    %64 = vector.load %arg19[%c0_64, %c0_65] : memref<16x2176xbf16, #tpu.memory_space<vmem>>, vector<16x128xbf16>
    tpu.vector_store %arg19[%c0_64, %c0_65], %63 {strides = array<i32>} : memref<16x2176xbf16, #tpu.memory_space<vmem>>, vector<16x128xbf16>,
    %c1_66 = arith.constant 1 : index
    %c0_67 = arith.constant 0 : index
    %65 = vector.load %arg18[%c1_66, %c0_67] : memref<32x128xbf16, #tpu.memory_space<vmem>>, vector<16x128xbf16>
    %c0_68 = arith.constant 0 : index
    %c128_69 = arith.constant 128 : index
    %66 = vector.load %arg19[%c0_68, %c128_69] : memref<16x2176xbf16, #tpu.memory_space<vmem>>, vector<16x128xbf16>
    tpu.vector_store %arg19[%c0_68, %c128_69], %65 {strides = array<i32>} : memref<16x2176xbf16, #tpu.memory_space<vmem>>, vector<16x128xbf16>,
    %c2_70 = arith.constant 2 : index
    %c0_71 = arith.constant 0 : index
    %67 = vector.load %arg18[%c2_70, %c0_71] : memref<32x128xbf16, #tpu.memory_space<vmem>>, vector<16x128xbf16>
    %c0_72 = arith.constant 0 : index
    %c256_73 = arith.constant 256 : index
    %68 = vector.load %arg19[%c0_72, %c256_73] : memref<16x2176xbf16, #tpu.memory_space<vmem>>, vector<16x128xbf16>
    tpu.vector_store %arg19[%c0_72, %c256_73], %67 {strides = array<i32>} : memref<16x2176xbf16, #tpu.memory_space<vmem>>, vector<16x128xbf16>,
    %c3_74 = arith.constant 3 : index
    %c0_75 = arith.constant 0 : index
    %69 = vector.load %arg18[%c3_74, %c0_75] : memref<32x128xbf16, #tpu.memory_space<vmem>>, vector<16x128xbf16>
    %c0_76 = arith.constant 0 : index
    %c384_77 = arith.constant 384 : index
    %70 = vector.load %arg19[%c0_76, %c384_77] : memref<16x2176xbf16, #tpu.memory_space<vmem>>, vector<16x128xbf16>
    tpu.vector_store %arg19[%c0_76, %c384_77], %69 {strides = array<i32>} : memref<16x2176xbf16, #tpu.memory_space<vmem>>, vector<16x128xbf16>,
    %c4_78 = arith.constant 4 : index
    %c0_79 = arith.constant 0 : index
    %71 = vector.load %arg18[%c4_78, %c0_79] : memref<32x128xbf16, #tpu.memory_space<vmem>>, vector<16x128xbf16>
    %c0_80 = arith.constant 0 : index
    %c512_81 = arith.constant 512 : index
    %72 = vector.load %arg19[%c0_80, %c512_81] : memref<16x2176xbf16, #tpu.memory_space<vmem>>, vector<16x128xbf16>
    tpu.vector_store %arg19[%c0_80, %c512_81], %71 {strides = array<i32>} : memref<16x2176xbf16, #tpu.memory_space<vmem>>, vector<16x128xbf16>,
    %c5_82 = arith.constant 5 : index
    %c0_83 = arith.constant 0 : index
    %73 = vector.load %arg18[%c5_82, %c0_83] : memref<32x128xbf16, #tpu.memory_space<vmem>>, vector<16x128xbf16>
    %c0_84 = arith.constant 0 : index
    %c640_85 = arith.constant 640 : index
    %74 = vector.load %arg19[%c0_84, %c640_85] : memref<16x2176xbf16, #tpu.memory_space<vmem>>, vector<16x128xbf16>
    tpu.vector_store %arg19[%c0_84, %c640_85], %73 {strides = array<i32>} : memref<16x2176xbf16, #tpu.memory_space<vmem>>, vector<16x128xbf16>,
    %c6_86 = arith.constant 6 : index
    %c0_87 = arith.constant 0 : index
    %75 = vector.load %arg18[%c6_86, %c0_87] : memref<32x128xbf16, #tpu.memory_space<vmem>>, vector<16x128xbf16>
    %c0_88 = arith.constant 0 : index
    %c768_89 = arith.constant 768 : index
    %76 = vector.load %arg19[%c0_88, %c768_89] : memref<16x2176xbf16, #tpu.memory_space<vmem>>, vector<16x128xbf16>
    tpu.vector_store %arg19[%c0_88, %c768_89], %75 {strides = array<i32>} : memref<16x2176xbf16, #tpu.memory_space<vmem>>, vector<16x128xbf16>,
    %c7_90 = arith.constant 7 : index
    %c0_91 = arith.constant 0 : index
    %77 = vector.load %arg18[%c7_90, %c0_91] : memref<32x128xbf16, #tpu.memory_space<vmem>>, vector<16x128xbf16>
    %c0_92 = arith.constant 0 : index
    %c896_93 = arith.constant 896 : index
    %78 = vector.load %arg19[%c0_92, %c896_93] : memref<16x2176xbf16, #tpu.memory_space<vmem>>, vector<16x128xbf16>
    tpu.vector_store %arg19[%c0_92, %c896_93], %77 {strides = array<i32>} : memref<16x2176xbf16, #tpu.memory_space<vmem>>, vector<16x128xbf16>,
    %c8_94 = arith.constant 8 : index
    %c0_95 = arith.constant 0 : index
    %79 = vector.load %arg18[%c8_94, %c0_95] : memref<32x128xbf16, #tpu.memory_space<vmem>>, vector<16x128xbf16>
    %c0_96 = arith.constant 0 : index
    %c1024_97 = arith.constant 1024 : index
    %80 = vector.load %arg19[%c0_96, %c1024_97] : memref<16x2176xbf16, #tpu.memory_space<vmem>>, vector<16x128xbf16>
    tpu.vector_store %arg19[%c0_96, %c1024_97], %79 {strides = array<i32>} : memref<16x2176xbf16, #tpu.memory_space<vmem>>, vector<16x128xbf16>,
    %c9 = arith.constant 9 : index
    %c0_98 = arith.constant 0 : index
    %81 = vector.load %arg18[%c9, %c0_98] : memref<32x128xbf16, #tpu.memory_space<vmem>>, vector<16x128xbf16>
    %c0_99 = arith.constant 0 : index
    %c1152 = arith.constant 1152 : index
    %82 = vector.load %arg19[%c0_99, %c1152] : memref<16x2176xbf16, #tpu.memory_space<vmem>>, vector<16x128xbf16>
    tpu.vector_store %arg19[%c0_99, %c1152], %81 {strides = array<i32>} : memref<16x2176xbf16, #tpu.memory_space<vmem>>, vector<16x128xbf16>,
    %c10 = arith.constant 10 : index
    %c0_100 = arith.constant 0 : index
    %83 = vector.load %arg18[%c10, %c0_100] : memref<32x128xbf16, #tpu.memory_space<vmem>>, vector<16x128xbf16>
    %c0_101 = arith.constant 0 : index
    %c1280 = arith.constant 1280 : index
    %84 = vector.load %arg19[%c0_101, %c1280] : memref<16x2176xbf16, #tpu.memory_space<vmem>>, vector<16x128xbf16>
    tpu.vector_store %arg19[%c0_101, %c1280], %83 {strides = array<i32>} : memref<16x2176xbf16, #tpu.memory_space<vmem>>, vector<16x128xbf16>,
    %c11 = arith.constant 11 : index
    %c0_102 = arith.constant 0 : index
    %85 = vector.load %arg18[%c11, %c0_102] : memref<32x128xbf16, #tpu.memory_space<vmem>>, vector<16x128xbf16>
    %c0_103 = arith.constant 0 : index
    %c1408 = arith.constant 1408 : index
    %86 = vector.load %arg19[%c0_103, %c1408] : memref<16x2176xbf16, #tpu.memory_space<vmem>>, vector<16x128xbf16>
    tpu.vector_store %arg19[%c0_103, %c1408], %85 {strides = array<i32>} : memref<16x2176xbf16, #tpu.memory_space<vmem>>, vector<16x128xbf16>,
    %c12 = arith.constant 12 : index
    %c0_104 = arith.constant 0 : index
    %87 = vector.load %arg18[%c12, %c0_104] : memref<32x128xbf16, #tpu.memory_space<vmem>>, vector<16x128xbf16>
    %c0_105 = arith.constant 0 : index
    %c1536 = arith.constant 1536 : index
    %88 = vector.load %arg19[%c0_105, %c1536] : memref<16x2176xbf16, #tpu.memory_space<vmem>>, vector<16x128xbf16>
    tpu.vector_store %arg19[%c0_105, %c1536], %87 {strides = array<i32>} : memref<16x2176xbf16, #tpu.memory_space<vmem>>, vector<16x128xbf16>,
    %c13 = arith.constant 13 : index
    %c0_106 = arith.constant 0 : index
    %89 = vector.load %arg18[%c13, %c0_106] : memref<32x128xbf16, #tpu.memory_space<vmem>>, vector<16x128xbf16>
    %c0_107 = arith.constant 0 : index
    %c1664 = arith.constant 1664 : index
    %90 = vector.load %arg19[%c0_107, %c1664] : memref<16x2176xbf16, #tpu.memory_space<vmem>>, vector<16x128xbf16>
    tpu.vector_store %arg19[%c0_107, %c1664], %89 {strides = array<i32>} : memref<16x2176xbf16, #tpu.memory_space<vmem>>, vector<16x128xbf16>,
    %c14 = arith.constant 14 : index
    %c0_108 = arith.constant 0 : index
    %91 = vector.load %arg18[%c14, %c0_108] : memref<32x128xbf16, #tpu.memory_space<vmem>>, vector<16x128xbf16>
    %c0_109 = arith.constant 0 : index
    %c1792 = arith.constant 1792 : index
    %92 = vector.load %arg19[%c0_109, %c1792] : memref<16x2176xbf16, #tpu.memory_space<vmem>>, vector<16x128xbf16>
    tpu.vector_store %arg19[%c0_109, %c1792], %91 {strides = array<i32>} : memref<16x2176xbf16, #tpu.memory_space<vmem>>, vector<16x128xbf16>,
    %c15 = arith.constant 15 : index
    %c0_110 = arith.constant 0 : index
    %93 = vector.load %arg18[%c15, %c0_110] : memref<32x128xbf16, #tpu.memory_space<vmem>>, vector<16x128xbf16>
    %c0_111 = arith.constant 0 : index
    %c1920 = arith.constant 1920 : index
    %94 = vector.load %arg19[%c0_111, %c1920] : memref<16x2176xbf16, #tpu.memory_space<vmem>>, vector<16x128xbf16>
    tpu.vector_store %arg19[%c0_111, %c1920], %93 {strides = array<i32>} : memref<16x2176xbf16, #tpu.memory_space<vmem>>, vector<16x128xbf16>,
    %c16 = arith.constant 16 : index
    %c0_112 = arith.constant 0 : index
    %95 = vector.load %arg18[%c16, %c0_112] : memref<32x128xbf16, #tpu.memory_space<vmem>>, vector<16x128xbf16>
    %c0_113 = arith.constant 0 : index
    %c2048 = arith.constant 2048 : index
    %96 = vector.load %arg19[%c0_113, %c2048] : memref<16x2176xbf16, #tpu.memory_space<vmem>>, vector<16x128xbf16>
    tpu.vector_store %arg19[%c0_113, %c2048], %95 {strides = array<i32>} : memref<16x2176xbf16, #tpu.memory_space<vmem>>, vector<16x128xbf16>,
    %c0_114 = arith.constant 0 : index
    %c0_115 = arith.constant 0 : index
    %97 = vector.load %arg19[%c0_114, %c0_115] : memref<16x2176xbf16, #tpu.memory_space<vmem>>, vector<16x2176xbf16>
    %c0_116 = arith.constant 0 : index
    %c0_117 = arith.constant 0 : index
    %98 = vector.load %arg10[%c0_116, %c0_117] : memref<2176x128xbf16, #tpu.memory_space<vmem>>, vector<2176x128xbf16>
    %cst_118 = arith.constant dense<0.000000e+00> : vector<16x128xf32>
    %99 = tpu.matmul %97, %98, %cst_118 {dimension_numbers = #tpu.dot_dimension_numbers<[1], [0], [0], [1], [0, 0, 1, 1], [], []>} : vector<16x2176xbf16>, vector<2176x128xbf16>, vector<16x128xf32> -> vector<16x128xf32>
    %c0_119 = arith.constant 0 : index
    %c0_120 = arith.constant 0 : index
    %100 = vector.load %arg11[%c0_119, %c0_120] : memref<1x128xf32, #tpu.memory_space<vmem>>, vector<1x128xf32>
    %101 = vector.broadcast %100 : vector<1x128xf32> to vector<16x128xf32>
    %102 = arith.addf %99, %101 : vector<16x128xf32>
    %cst_121 = arith.constant 0.000000e+00 : f32
    %103 = vector.broadcast %cst_121 : f32 to vector<16x128xf32>
    %104 = arith.maximumf %102, %103 : vector<16x128xf32>
    %c0_122 = arith.constant 0 : index
    %c0_123 = arith.constant 0 : index
    %105 = vector.load %arg12[%c0_122, %c0_123] : memref<64x128xbf16, #tpu.memory_space<vmem>>, vector<64x128xbf16>
    %cst_124 = arith.constant dense<0.000000e+00> : vector<16x128xf32>
    %106 = tpu.matmul %1, %105, %cst_124 {dimension_numbers = #tpu.dot_dimension_numbers<[1], [0], [0], [1], [0, 0, 1, 1], [], []>} : vector<16x64xbf16>, vector<64x128xbf16>, vector<16x128xf32> -> vector<16x128xf32>
    %c0_125 = arith.constant 0 : index
    %c0_126 = arith.constant 0 : index
    %107 = vector.load %arg13[%c0_125, %c0_126] : memref<1x128xf32, #tpu.memory_space<vmem>>, vector<1x128xf32>
    %108 = vector.broadcast %107 : vector<1x128xf32> to vector<16x128xf32>
    %109 = arith.addf %106, %108 : vector<16x128xf32>
    %cst_127 = arith.constant 0.000000e+00 : f32
    %110 = vector.broadcast %cst_127 : f32 to vector<16x128xf32>
    %111 = arith.maximumf %109, %110 : vector<16x128xf32>
    %112 = arith.addf %104, %111 : vector<16x128xf32>
    %c0_128 = arith.constant 0 : index
    %c0_129 = arith.constant 0 : index
    %c0_130 = arith.constant 0 : index
    %113 = vector.load %arg15[%c0_128, %c0_129, %c0_130] : memref<1x16x128xf32, #tpu.memory_space<vmem>>, vector<1x16x128xf32>
    %114 = vector.shape_cast %113 : vector<1x16x128xf32> to vector<16x128xf32>
    %115 = vector.shape_cast %112 : vector<16x128xf32> to vector<1x16x128xf32>
    tpu.vector_store %arg15[%c0_128, %c0_129, %c0_130], %115 {strides = array<i32>} : memref<1x16x128xf32, #tpu.memory_space<vmem>>, vector<1x16x128xf32>,
    return
  }
  func.func @transform_0(%arg0: i32) -> (i32, i32, i32) {
    %c0_i32 = arith.constant 0 : i32
    %c0_i32_0 = arith.constant 0 : i32
    %c0_i32_1 = arith.constant 0 : i32
    return %arg0, %c0_i32, %c0_i32_0 : i32, i32, i32
  }
  func.func @transform_1(%arg0: i32) -> (i32, i32) {
    %c0_i32 = arith.constant 0 : i32
    %c0_i32_0 = arith.constant 0 : i32
    %c0_i32_1 = arith.constant 0 : i32
    return %c0_i32, %c0_i32_0 : i32, i32
  }
  func.func @transform_2(%arg0: i32) -> (i32, i32) {
    %c0_i32 = arith.constant 0 : i32
    %c0_i32_0 = arith.constant 0 : i32
    %c0_i32_1 = arith.constant 0 : i32
    return %c0_i32, %c0_i32_0 : i32, i32
  }
  func.func @transform_3(%arg0: i32) -> (i32, i32) {
    %c0_i32 = arith.constant 0 : i32
    %c0_i32_0 = arith.constant 0 : i32
    %c0_i32_1 = arith.constant 0 : i32
    return %c0_i32, %c0_i32_0 : i32, i32
  }
  func.func @transform_4(%arg0: i32) -> (i32, i32) {
    %c0_i32 = arith.constant 0 : i32
    %c0_i32_0 = arith.constant 0 : i32
    %c0_i32_1 = arith.constant 0 : i32
    return %c0_i32, %c0_i32_0 : i32, i32
  }
  func.func @transform_5(%arg0: i32) -> (i32, i32) {
    %c0_i32 = arith.constant 0 : i32
    %c0_i32_0 = arith.constant 0 : i32
    %c0_i32_1 = arith.constant 0 : i32
    return %c0_i32, %c0_i32_0 : i32, i32
  }
  func.func @transform_6(%arg0: i32) -> (i32, i32) {
    %c0_i32 = arith.constant 0 : i32
    %c0_i32_0 = arith.constant 0 : i32
    %c0_i32_1 = arith.constant 0 : i32
    return %c0_i32, %c0_i32_0 : i32, i32
  }
  func.func @transform_7(%arg0: i32) -> (i32, i32) {
    %c0_i32 = arith.constant 0 : i32
    %c0_i32_0 = arith.constant 0 : i32
    %c0_i32_1 = arith.constant 0 : i32
    return %c0_i32, %c0_i32_0 : i32, i32
  }
  func.func @transform_8(%arg0: i32) -> (i32, i32) {
    %c0_i32 = arith.constant 0 : i32
    %c0_i32_0 = arith.constant 0 : i32
    %c0_i32_1 = arith.constant 0 : i32
    return %c0_i32, %c0_i32_0 : i32, i32
  }
  func.func @transform_9(%arg0: i32) -> (i32, i32) {
    %c0_i32 = arith.constant 0 : i32
    %c0_i32_0 = arith.constant 0 : i32
    %c0_i32_1 = arith.constant 0 : i32
    return %c0_i32, %c0_i32_0 : i32, i32
  }
  func.func @transform_10(%arg0: i32) -> (i32, i32) {
    %c0_i32 = arith.constant 0 : i32
    %c0_i32_0 = arith.constant 0 : i32
    %c0_i32_1 = arith.constant 0 : i32
    return %c0_i32, %c0_i32_0 : i32, i32
  }
  func.func @transform_11(%arg0: i32) -> (i32, i32) {
    %c0_i32 = arith.constant 0 : i32
    %c0_i32_0 = arith.constant 0 : i32
    %c0_i32_1 = arith.constant 0 : i32
    return %c0_i32, %c0_i32_0 : i32, i32
  }
  func.func @transform_12(%arg0: i32) -> (i32, i32) {
    %c0_i32 = arith.constant 0 : i32
    %c0_i32_0 = arith.constant 0 : i32
    %c0_i32_1 = arith.constant 0 : i32
    return %c0_i32, %c0_i32_0 : i32, i32
  }
  func.func @transform_13(%arg0: i32) -> (i32, i32, i32) {
    %c0_i32 = arith.constant 0 : i32
    %c0_i32_0 = arith.constant 0 : i32
    %c0_i32_1 = arith.constant 0 : i32
    return %arg0, %c0_i32, %c0_i32_0 : i32, i32, i32
  }
  func.func @transform_14(%arg0: i32) -> (i32, i32, i32) {
    %c0_i32 = arith.constant 0 : i32
    %c0_i32_0 = arith.constant 0 : i32
    %c0_i32_1 = arith.constant 0 : i32
    return %arg0, %c0_i32, %c0_i32_0 : i32, i32, i32
  }
}

</mosaic_0001>

<bundles_post_ra>
// kernel: _lambda_.1
= control target key start
LH: loop header
LB: loop body
LE: loop exit
PB: predicated region body
PF: predicated region fallthrough
CT: control target
= control target key end

     0   :  { %20 = vsyncpa [#allocation7], 0  ;;  %s5042_s0 = inlined_call_operand.vmem [shape: bf16[2,16,64], index: 0, kind: input, shape index: {}]   ;;  %s5043_s1 = inlined_call_operand.vmem [shape: bf16[64,128], index: 1, kind: input, shape index: {}]   ;;  %s5044_s2 = inlined_call_operand.vmem [shape: f32[1,128], index: 2, kind: input, shape index: {}]   ;;  %s5045_s3 = inlined_call_operand.hbm [shape: bf16[1152,128], index: 3, kind: input, shape index: {}]   ;;  %s5046_s4 = inlined_call_operand.vmem [shape: f32[1,128], index: 4, kind: input, shape index: {}]   ;;  %s5047_s5 = inlined_call_operand.vmem [shape: bf16[64,128], index: 5, kind: input, shape index: {}]   ;;  %s5048_s6 = inlined_call_operand.vmem [shape: f32[1,128], index: 6, kind: input, shape index: {}]   ;;  %s5049_s7 = inlined_call_operand.vmem [shape: bf16[64,128], index: 7, kind: input, shape index: {}]   ;;  %s5050_s8 = inlined_call_operand.vmem [shape: f32[1,128], index: 8, kind: input, shape index: {}]   ;;  %s5051_s9 = inlined_call_operand.hbm [shape: bf16[2176,128], index: 9, kind: input, shape index: {}]   ;;  %s5052_s10 = inlined_call_operand.vmem [shape: f32[1,128], index: 10, kind: input, shape index: {}]   ;;  %s5053_s11 = inlined_call_operand.vmem [shape: bf16[64,128], index: 11, kind: input, shape index: {}]   ;;  %s5054_s12 = inlined_call_operand.vmem [shape: f32[1,128], index: 12, kind: input, shape index: {}]   ;;  %s5055_s13 = inlined_call_operand.vmem [shape: f32[2,16,128], index: 13, kind: output, shape index: {0}]   ;;  %s5056_s14 = inlined_call_operand.vmem [shape: f32[2,16,128], index: 14, kind: output, shape index: {1}]  }
   0x1   :  { %21 = vsyncpa [#allocation9], 0  ;;  %s4797_s29 = smov 0  }
   0x2 LB: > { %5060 = sst [smem:[#allocation12_spill]] %s4713_s29  ;;  %s4803_s30 = sadd.s32 4294967295, %s4713_s29   ;;  %s4713_s29 = sphi %s4797_s29, %s27_s29  }
   0x3   : > { %p3703_p0 = scmp.ge.s32.totalorder %s4713_s29, 1  ;;  %p362_p1 = scmp.lt.s32.totalorder %s4713_s29, 3 }
   0x4   : > { %s4715_s15 = smov [#allocation6]   ;;  %p5057_p3 = scmp.eq.s32.totalorder %s4803_s30, 0 }
   0x5   : > { %s380_s16 = sshll.u32 %s4715_s15, 4  ;;  %p4807_p2 = pnand %p3703_p0, %p362_p1  ;;  %s381_s16 = int_to_ptr.vmem [resolvable:$true] %s380_s16 }
   0x6   : > { %s4716_s18 = smov [#allocation8]   ;;  %s4643_s23 = scalar_lea.hbm %s5045_s3, 9216 }
   0x7   : > { %s5061_s17 = scalar_select %p4807_p2, 1, 0 }
   0x8   : > { %p4374_p4 = pneg %p4807_p2  ;;  %s408_s19 = sshll.u32 %s4716_s18, 4  ;;  %s4820_s19 = int_to_ptr.vmem [resolvable:$true] %s408_s19 }
   0x9   : > { %p4644_p6 = scmp.ne.s32.totalorder %s5045_s3, %s4643_s23  ;;  %p4650_p10 = scmp.lt.u32.totalorder %s4643_s23, %s5045_s3 }
   0xa   : > { %p4816_p5 = pnand %p5057_p3, %p4374_p4 }
   0xc   : > { %p4645_p7 = pneg %p4816_p5 }
   0xe   : > { %p4646_p8 = pnand %p4645_p7, %p4644_p6 }
  0x10   : > { %p4647_p9 = pneg %p4646_p8 }
  0x12   : > { %p4652_p11 = pnand %p4650_p10, %p4647_p9 }
  0x14   : > { %4655 = shalt.err (!%p4652_p11)
}
  0x15   : > { %s4656_s28 = scalar_lea.vmem %s381_s16, 9216  ;;  %p4664_p1 = scmp.lt.s32.totalorder %s381_s16, %s381_s16 }
  0x16   : > { %p4657_p12 = scmp.ne.s32.totalorder %s381_s16, %s4656_s28  ;;  %p4665_p4 = scmp.lt.s32.totalorder %s4656_s28, %s4656_s28 }
  0x18   : > { %p4659_p13 = pnand %p4657_p12, %p4645_p7  ;;  %p4666_p3 = por %p4665_p4, %p4664_p1 }
  0x1a   : > { %p4660_p0 = pneg %p4659_p13 }
  0x1c   : > { %p4667_p2 = pnand %p4666_p3, %p4660_p0 }
  0x1e   : > { %4670 = shalt.err (!%p4667_p2)
}
  0x1f   : > { %s4717_s15 = smov 64   ;;  %s4718_s18 = smov 4  }
  0x20   : > { %4377 = dma.hbm_to_vmem [thread:$0]  (!%p4816_p5), %s5045_s3, 9216, %s381_s16, [#allocation7], %s4717_s15, %s4717_s15, %s4718_s18  }
  0x21   : > { %s4671_s25 = scalar_lea.hbm %s5051_s9, 17408 }
  0x22   : > { %p4672_p6 = scmp.ne.s32.totalorder %s5051_s9, %s4671_s25  ;;  %p4678_p8 = scmp.lt.u32.totalorder %s4671_s25, %s5051_s9 }
  0x24   : > { %p4674_p2 = pnand %p4672_p6, %p4645_p7 }
  0x26   : > { %p4675_p3 = pneg %p4674_p2 }
  0x28   : > { %p4680_p9 = pnand %p4678_p8, %p4675_p3 }
  0x2a   : > { %4683 = shalt.err (!%p4680_p9)
}
  0x2b   : > { %s4684_s16 = scalar_lea.vmem %s4820_s19, 17408  ;;  %p4692_p13 = scmp.lt.s32.totalorder %s4820_s19, %s4820_s19 }
  0x2c   : > { %p4685_p10 = scmp.ne.s32.totalorder %s4820_s19, %s4684_s16  ;;  %p4693_p0 = scmp.lt.s32.totalorder %s4684_s16, %s4684_s16 }
  0x2e   : > { %p4687_p11 = pnand %p4685_p10, %p4645_p7  ;;  %p4694_p1 = por %p4693_p0, %p4692_p13 }
  0x30   : > { %p4688_p12 = pneg %p4687_p11 }
  0x32   : > { %p4695_p4 = pnand %p4694_p1, %p4688_p12 }
  0x34   : > { %4698 = shalt.err (!%p4695_p4)
}
  0x35   : > { %4380 = dma.hbm_to_vmem [thread:$0]  (!%p4816_p5), %s5051_s9, 17408, %s4820_s19, [#allocation9], %s4717_s15, %s4717_s15, %s4718_s18  }
  0x36   : > { %p5063_p6 = scmp.ne.s32.totalorder %s5061_s17, 0 }
  0x37   : > { %p5064_p2 = scmp.eq.s32.totalorder (!%p5063_p6), %s4803_s30, 0 }
  0x38   : > { %441 = sbr.rel (%p5063_p6) target bundleno = 977 (0x3d1), region = 72 }
  0x3f   : > { %4704 = dma.done.wait (%p5064_p2), [#allocation7], 9216   ;;  %p5065_p7 = pmov %p5064_p2 }
  0x40   : > { %p5066_p3 = pmov %p5064_p2 }
  0x41   : > { %4706 = vsyncadd (%p5065_p7), [#allocation7], 4294958080 }
  0x42   : > { %4708 = dma.done.wait (%p5066_p3), [#allocation9], 17408   ;;  %p5067_p8 = pmov %p5064_p2 }
  0x43   : > { %p496_p9 = scmp.lt.s32.totalorder %s4803_s30, 1  ;;  %v4719_v0 = vmov 0.0   ;;  %vm4720_vm0 = vmmov 0   ;;  %v4400_v1 = vld [vmem:[%s5043_s1] sm:$0xff]   ;;  %v4401_v2 = vld [vmem:[%s5043_s1 + $0x8] sm:$0xff]   ;;  %v4402_v3 = vld [vmem:[%s5043_s1 + $0x10] sm:$0xff]  }
  0x44   : > { %4710 = vsyncadd (%p5067_p8), [#allocation9], 4294949888  ;;  %4278 = vmatprep.subr.bf16.mxu0 %v4719_v0  ;;  %4286 = vmatprep.mubr.msk.bf16.mxu0 %vm4720_vm0, %v4719_v0  ;;  %v4405_v4 = vld [vmem:[#allocation6 + $0x40] sm:$0xff]   ;;  %vm558_vm1 = vcmask 523264   ;;  %v4409_v10 = vld [vmem:[#allocation6 + $0x48] sm:$0xff]   ;;  %v4721_v22 = vmov 0  }
  0x45   : > { %s5070_s30 = smov (!%p496_p9, %s4803_s30), 1  ;;  %4279 = vmatpush3.bf16.msra.mxu0 %v4400_v1  ;;  %v4406_v5 = vld [vmem:[#allocation6] sm:$0xff]   ;;  %3981 = vmatprep.subr.bf16.mxu1 %v4405_v4  ;;  %v4410_v11 = vld [vmem:[#allocation6 + $0x8] sm:$0xff]   ;;  %v4413_v14 = vld [vmem:[#allocation6 + $0x50] sm:$0xff]   ;;  %605 = vst [vmem:[#allocation2] sm:$0x3] %v4721_v22 }
  0x46   : > { %s3971_s20 = sshll.u32 %s5070_s30, 3  ;;  %4280 = vmatprep.subr.bf16.mxu0 %v4719_v0  ;;  %v4403_v6 = vld [vmem:[%s5043_s1 + $0x18] sm:$0xff]   ;;  %3982 = vmatpush3.bf16.msra.mxu1 %v4406_v5  ;;  %v4411_v12 = vld [vmem:[#allocation6 + $0xc8] sm:$0xff]   ;;  %v4414_v15 = vld [vmem:[#allocation6 + $0x10] sm:$0xff]   ;;  %606 = vst [vmem:[#allocation2 + $0x8] sm:$0xc] %v4721_v22 }
  0x47   : > { %s4897_s24 = scalar_lea.vmem %s5042_s0, %s3971_s20  ;;  %v4407_v7 = vld [vmem:[#allocation6 + $0xc0] sm:$0xff]   ;;  %3983 = vmatprep.subr.bf16.mxu1 %v4409_v10  ;;  %v4412_v13 = vld [vmem:[#allocation6 + $0x88] sm:$0xff]   ;;  %v4415_v16 = vld [vmem:[#allocation6 + $0xd0] sm:$0xff]   ;;  %1782 = vst [vmem:[#allocation4] sm:$0xf] %v4721_v22  ;;  %vm613_vm2 = vcmask 1041408  }
  0x48   : > { %v4404_v8 = vld [vmem:[%s4897_s24] sm:$0xff]   ;;  %v4416_v17 = vld [vmem:[#allocation6 + $0x90] sm:$0xff]   ;;  %v4417_v18 = vld [vmem:[#allocation6 + $0x58] sm:$0xff]   ;;  %1783 = vst [vmem:[#allocation4 + $0x8] sm:$0xf0] %v4721_v22  ;;  %vm614_vm3 = vcmask 1045508  }
  0x49   : > { %4281 = vmatpush3.bf16.msra.mxu0 %v4401_v2  ;;  %v4408_v9 = vld [vmem:[#allocation6 + $0x80] sm:$0xff]   ;;  %v4418_v19 = vld [vmem:[#allocation6 + $0x18] sm:$0xff]   ;;  %v4425_v27 = vld [vmem:[#allocation6 + $0x68] sm:$0xff]   ;;  %vm647_vm5 = vsmask.f32 7424  ;;  %vm673_vm7 = vcmask 1046528  }
  0x4a   : > { %4282 = vmatprep.subr.bf16.mxu0 %v4719_v0  ;;  %3984 = vmatpush3.bf16.msra.mxu1 %v4410_v11  ;;  %v4419_v20 = vld [vmem:[#allocation6 + $0xd8] sm:$0xff]   ;;  %v4421_v23 = vld [vmem:[#allocation6 + $0x60] sm:$0xff]   ;;  %v4426_v28 = vld [vmem:[#allocation6 + $0x28] sm:$0xff]   ;;  %vm690_vm6 = vsmask.f32 6400  ;;  %vm721_vm10 = vcmask 1045504  }
  0x4b   : > { %3985 = vmatprep.subr.bf16.mxu1 %v4413_v14  ;;  %v4420_v21 = vld [vmem:[#allocation6 + $0x98] sm:$0xff]   ;;  %v4422_v24 = vld [vmem:[#allocation6 + $0x20] sm:$0xff]   ;;  %v4427_v29 = vld [vmem:[#allocation6 + $0xe8] sm:$0xff]   ;;  %vm738_vm8 = vsmask.f32 5376  ;;  %vm769_vm11 = vcmask 1044480  }
  0x4c   : > { %v4423_v25 = vld [vmem:[#allocation6 + $0xe0] sm:$0xff]   ;;  %v4428_v30 = vld [vmem:[#allocation6 + $0xa8] sm:$0xff]   ;;  %v4429_v31 = vld [vmem:[#allocation6 + $0x70] sm:$0xff]   ;;  %vm786_vm9 = vsmask.f32 4352  ;;  %s3972_s22 = sshll.u32 %s5070_s30, 4 }
  0x4d   : > { %4283 = vmatpush3.bf16.msra.mxu0 %v4402_v3  ;;  %v4424_v26 = vld [vmem:[#allocation6 + $0xa0] sm:$0xff]   ;;  %v4431_v32 = vld [vmem:[#allocation6 + $0xf0] sm:$0xff]   ;;  %v4433_v35 = vld [vmem:[#allocation6 + $0x78] sm:$0xff]   ;;  %s505_s28 = scalar_lea.vmem %s5055_s13, %s3972_s22  ;;  %vm1910_vm12 = vsmask.f32 3328  ;;  %vm1902_vm14 = vcmask 1043456   ;;  %s510_s16 = scalar_lea.vmem %s5056_s14, %s3972_s22 }
  0x4e   : > { %4284 = vmatprep.subr.bf16.mxu0 %v4719_v0  ;;  %3986 = vmatpush3.bf16.msra.mxu1 %v4414_v15  ;;  %v4430_v33 = vld [vmem:[#allocation6 + $0x30] sm:$0xff]   ;;  %v4435_v36 = vld [vmem:[#allocation6 + $0xf8] sm:$0xff]   ;;  %v4439_v39 = vld [vmem:[#allocation6 + $0x140] sm:$0xff]   ;;  %vm1942_vm13 = vsmask.f32 2304  ;;  %vm1934_vm15 = vcmask 1042432  }
  0x4f   : > { %3987 = vmatprep.subr.bf16.mxu1 %v4417_v18  ;;  %v4432_v34 = vld [vmem:[#allocation6 + $0xb0] sm:$0xff]   ;;  %v4434_v37 = vld [vmem:[#allocation6 + $0x38] sm:$0xff]   ;;  %v4444_v40 = vld [vmem:[#allocation6 + $0x1c0] sm:$0xff]  }
  0x50   : > { %v4436_v38 = vld [vmem:[#allocation6 + $0xb8] sm:$0xff]   ;;  %v3716_v41 = vld [vmem:[%s5044_s2] ss:$0 sm:$0xff]  ;;  %vm615_vm4 = vmor %vm613_vm2, %vm614_vm3  ;;  %vm1973_vm3 = vsmask.f32 1280 }
  0x51   : > { %4285 = vmatpush3.bf16.msra.mxu0 %v4403_v6  ;;  %v4443_v6 = vld [vmem:[#allocation6 + $0x100] sm:$0xff]  }
  0x52   : > { %4003 = vmatprep.subr.bf16.mxu0 %v4407_v7  ;;  %3988 = vmatpush3.bf16.msra.mxu1 %v4418_v19 }
  0x53   : > { %3989 = vmatprep.subr.bf16.mxu1 %v4421_v23  ;;  %v4449_v23 = vld [vmem:[#allocation6 + $0x180] sm:$0xff]  }
  0x54   : > { %4287 = vmatmul.mubr.msk.bf16.vlgmr.msra.gmra.mrb[0].mxu0 %vm558_vm1, %v4404_v8 }
  0x55   : > { %4004 = vmatpush3.bf16.msra.mxu0 %v4408_v9 }
  0x56   : > { %4005 = vmatprep.subr.bf16.mxu0 %v4411_v12  ;;  %3990 = vmatpush3.bf16.msra.mxu1 %v4422_v24  ;;  %v4452_v12 = vld [vmem:[#allocation6 + $0x148] sm:$0xff]  }
  0x57   : > { %3991 = vmatprep.subr.bf16.mxu1 %v4425_v27  ;;  %v4453_v24 = vld [vmem:[#allocation6 + $0x108] sm:$0xff]  }
  0x59   : > { %4006 = vmatpush3.bf16.msra.mxu0 %v4412_v13 }
  0x5a   : > { %4007 = vmatprep.subr.bf16.mxu0 %v4415_v16  ;;  %3992 = vmatpush3.bf16.msra.mxu1 %v4426_v28 }
  0x5b   : > { %3993 = vmatprep.subr.bf16.mxu1 %v4429_v31 }
  0x5d   : > { %4008 = vmatpush3.bf16.msra.mxu0 %v4416_v17 }
  0x5e   : > { %4009 = vmatprep.subr.bf16.mxu0 %v4419_v20  ;;  %3994 = vmatpush3.bf16.msra.mxu1 %v4430_v33 }
  0x5f   : > { %3995 = vmatprep.subr.bf16.mxu1 %v4433_v35 }
  0x61   : > { %4010 = vmatpush3.bf16.msra.mxu0 %v4420_v21 }
  0x62   : > { %4011 = vmatprep.subr.bf16.mxu0 %v4423_v25  ;;  %3996 = vmatpush3.bf16.msra.mxu1 %v4434_v37  ;;  %v4454_v37 = vld [vmem:[#allocation6 + $0x1c8] sm:$0xff]  }
  0x63   : > { %4025 = vmatprep.subr.bf16.mxu1 %v4439_v39 }
  0x65   : > { %4012 = vmatpush3.bf16.msra.mxu0 %v4424_v26 }
  0x66   : > { %4013 = vmatprep.subr.bf16.mxu0 %v4427_v29 }
  0x69   : > { %4014 = vmatpush3.bf16.msra.mxu0 %v4428_v30 }
  0x6a   : > { %4015 = vmatprep.subr.bf16.mxu0 %v4431_v32 }
  0x6d   : > { %4016 = vmatpush3.bf16.msra.mxu0 %v4432_v34 }
  0x6e   : > { %4017 = vmatprep.subr.bf16.mxu0 %v4435_v36 }
  0x71   : > { %4018 = vmatpush3.bf16.msra.mxu0 %v4436_v38  ;;  %v4456_v38 = vld [vmem:[#allocation6 + $0x150] sm:$0xff]  }
  0x72   : > { %4047 = vmatprep.subr.bf16.mxu0 %v4444_v40 }
 0x127   : > { %v596_v42 = vpop.f32.mrb[0].mxu0 }
 0x128   : > { %v597_v43 = vadd.f32 %v3716_v41, %v596_v42  ;;  %v4288_v44 = vpop.f32.mrb[1].mxu0 }
 0x129   : > { %v599_v45 = vpop.f32.mrb[2].mxu0 }
 0x12a   : > { %v603_v46 = vmax.f32 %v597_v43, 0.0  ;;  %v600_v47 = vadd.f32 %v3716_v41, %v599_v45  ;;  %v4289_v48 = vpop.f32.mrb[3].mxu0 }
 0x12c   : > { %v3974_v49 = vpack.c.bf16 %v603_v46, %v603_v46  ;;  %v604_v50 = vmax.f32 %v600_v47, 0.0 }
 0x12e   : > { %v616_v51 = vrot.slane %v3974_v49, 6  ;;  %v3975_v52 = vpack.c.bf16 %v604_v50, %v604_v50  ;;  %v4455_v49 = vld [vmem:[#allocation6 + $0x188] sm:$0xff]   ;;  %v4457_v50 = vld [vmem:[#allocation6 + $0x110] sm:$0xff]  }
 0x130   : > { %v617_v53 = vrot.slane %v616_v51, 4  ;;  %624 = vst [vmem:[#allocation2] sm:$0xc] %v616_v51  ;;  %v618_v54 = vrot.slane %v3975_v52, 6  ;;  %v4458_v52 = vld [vmem:[#allocation6 + $0x1d0] sm:$0xff]  }
 0x132   : > { %v619_v55 = vsel %vm615_vm4, %v617_v53, %v618_v54  ;;  %v620_v56 = vrot.slane %v618_v54, 4  ;;  %v4460_v53 = vld [vmem:[#allocation6 + $0x158] sm:$0xff]   ;;  %vm2005_vm4 = vsmask.f32 256 }
 0x133   : > { %625 = vst [vmem:[#allocation2 + $0x4] sm:$0xf] %v619_v55 }
 0x134   : > { %626 = vst [vmem:[#allocation2 + $0x8] sm:$0x3] %v620_v56 }
 0x13a   : > { %v4437_v57 = vld [vmem:[#allocation2] sm:$0xff]  }
 0x13b   : > { %v4438_v58 = vld [vmem:[#allocation2 + $0x8] ss:$0 sps:$4 sm:$0x11]   ;;  %v651_v59 = vshll.u32 %v4437_v57, 16  ;;  %v4441_v61 = vld [vmem:[#allocation2] sm:$0xfe]  }
 0x13c   : > { %v656_v60 = vshll.u32 %v4438_v58, 16  ;;  %v4442_v62 = vld [vmem:[#allocation2 + $0x8] ss:$0 sps:$4 sm:$0x33]   ;;  %v649_v63 = vshrl.u32 %v4437_v57, 16  ;;  %v692_v3 = vshrl.u32 %v4441_v61, 16 }
 0x13d   : > { %v653_v1 = vrot.slane %v651_v59, 1  ;;  %v695_v4 = vshll.u32 %v4441_v61, 16  ;;  %v700_v5 = vshrl.u32 %v4442_v62, 16  ;;  %v4445_v7 = vld [vmem:[#allocation2] sm:$0xfe]   ;;  %v703_v10 = vshll.u32 %v4442_v62, 16 }
 0x13e   : > { %v658_v2 = vrot.slane %v656_v60, 1  ;;  %v4440_v9 = vld [vmem:[#allocation2] sm:$0xff]   ;;  %v4446_v11 = vld [vmem:[#allocation2 + $0x8] ss:$0 sps:$4 sm:$0x11]   ;;  %v694_v13 = vrot.slane %v692_v3, 1 }
 0x13f   : > { %v654_v8 = vor.u32 %v653_v1, %v649_v63  ;;  %v697_v14 = vrot.slane %v695_v4, 2  ;;  %v702_v15 = vrot.slane %v700_v5, 1  ;;  %v674_v16 = vrot.slane %v4445_v7, 1  ;;  %v4447_v20 = vld [vmem:[#allocation2] sm:$0xfc]   ;;  %v4459_v57 = vld [vmem:[#allocation6 + $0x190] sm:$0xff]  }
 0x140   : > { %v705_v18 = vrot.slane %v703_v10, 2  ;;  %v675_v19 = vrot.slane %v4446_v11, 1  ;;  %v4448_v22 = vld [vmem:[#allocation2 + $0x8] ss:$0 sps:$4 sm:$0x77]   ;;  %v740_v26 = vshrl.u32 %v4447_v20, 16 }
 0x141   : > { %v659_v17 = vsel %vm647_vm5, %v654_v8, %v658_v2  ;;  %v698_v21 = vor.u32 %v697_v14, %v694_v13  ;;  %v743_v27 = vshll.u32 %v4447_v20, 16  ;;  %v4450_v28 = vld [vmem:[#allocation2] sm:$0xf8]   ;;  %v4451_v29 = vld [vmem:[#allocation2 + $0x8] ss:$0 sps:$4 sm:$0xff]   ;;  %v748_v31 = vshrl.u32 %v4448_v22, 16 }
 0x142   : > { %1439 = vmatprep.mubr.bf16.mxu1 %v659_v17  ;;  %v706_v25 = vor.u32 %v705_v18, %v702_v15  ;;  %v676_v30 = vsel %vm673_vm7, %v674_v16, %v675_v19  ;;  %v751_v32 = vshll.u32 %v4448_v22, 16  ;;  %v742_v34 = vrot.slane %v740_v26, 2  ;;  %v4461_v58 = vld [vmem:[#allocation6 + $0x118] sm:$0xff]   ;;  %v4464_v61 = vld [vmem:[#allocation6 + $0x160] sm:$0xff]   ;;  %v4468_v2 = vld [vmem:[#allocation6 + $0x168] sm:$0xff]  }
 0x143   : > { %1440 = vmatmul.mubr.bf16.vlgmr.msra.gmra.mrb[0].mxu1 %v4440_v9  ;;  %v745_v35 = vrot.slane %v743_v27, 3  ;;  %v788_v36 = vshrl.u32 %v4450_v28, 16  ;;  %v750_v39 = vrot.slane %v748_v31, 2  ;;  %v791_v41 = vshll.u32 %v4450_v28, 16  ;;  %v4462_v60 = vld [vmem:[#allocation6 + $0x1d8] sm:$0xff]   ;;  %v4465_v63 = vld [vmem:[#allocation6 + $0x120] sm:$0xff]  }
 0x144   : > { %4026 = vmatpush3.bf16.msra.mxu1 %v4443_v6  ;;  %v707_v33 = vsel %vm690_vm6, %v698_v21, %v706_v25  ;;  %v753_v40 = vrot.slane %v751_v32, 3  ;;  %v796_v42 = vshrl.u32 %v4451_v29, 16  ;;  %v799_v45 = vshll.u32 %v4451_v29, 16  ;;  %v4463_v62 = vld [vmem:[#allocation6 + $0x198] sm:$0xff]   ;;  %v4466_v1 = vld [vmem:[#allocation6 + $0x1e0] sm:$0xff]   ;;  %v4469_v4 = vld [vmem:[#allocation6 + $0x128] sm:$0xff]  }
 0x145   : > { %4027 = vmatprep.subr.bf16.mxu1 %v4452_v12  ;;  %1480 = vmatprep.mubr.bf16.mxu0 %v707_v33  ;;  %v746_v43 = vor.u32 %v745_v35, %v742_v34  ;;  %v790_v44 = vrot.slane %v788_v36, 3  ;;  %v793_v47 = vrot.slane %v791_v41, 4  ;;  %v4467_v3 = vld [vmem:[#allocation6 + $0x1a0] sm:$0xff]   ;;  %v4470_v5 = vld [vmem:[#allocation6 + $0x1e8] sm:$0xff]   ;;  %v4472_v6 = vld [vmem:[#allocation6 + $0x170] sm:$0xff]  }
 0x146   : > { %1481 = vmatmul.mubr.bf16.vlgmr.msra.gmra.mrb[4].mxu0 %v676_v30  ;;  %v754_v46 = vor.u32 %v753_v40, %v750_v39  ;;  %v798_v48 = vrot.slane %v796_v42, 3  ;;  %v801_v51 = vrot.slane %v799_v45, 4  ;;  %v4471_v7 = vld [vmem:[#allocation6 + $0x1a8] sm:$0xff]   ;;  %v4473_v8 = vld [vmem:[#allocation6 + $0x130] sm:$0xff]   ;;  %v4476_v10 = vld [vmem:[#allocation6 + $0x178] sm:$0xff]  }
 0x147   : > { %4048 = vmatpush3.bf16.msra.mxu0 %v4449_v23  ;;  %v794_v55 = vor.u32 %v793_v47, %v790_v44  ;;  %v4474_v9 = vld [vmem:[#allocation6 + $0x1f0] sm:$0xff]   ;;  %v4480_v11 = vld [vmem:[#allocation2] sm:$0xfc]   ;;  %v4481_v12 = vld [vmem:[#allocation2 + $0x8] ss:$0 sps:$4 sm:$0x33]  }
 0x148   : > { %4028 = vmatpush3.bf16.msra.mxu1 %v4453_v24  ;;  %4049 = vmatprep.subr.bf16.mxu0 %v4454_v37  ;;  %v755_v54 = vsel %vm738_vm8, %v746_v43, %v754_v46  ;;  %v802_v56 = vor.u32 %v801_v51, %v798_v48  ;;  %v4475_v13 = vld [vmem:[#allocation6 + $0x1b0] sm:$0xff]   ;;  %v4477_v14 = vld [vmem:[#allocation6 + $0x138] sm:$0xff]   ;;  %v722_v16 = vrot.slane %v4480_v11, 2  ;;  %v723_v17 = vrot.slane %v4481_v12, 2  ;;  %v4482_v18 = vld [vmem:[#allocation2] sm:$0xf8]  }
 0x149   : > { %4029 = vmatprep.subr.bf16.mxu1 %v4456_v38  ;;  %1521 = vmatprep.mubr.bf16.mxu1 %v755_v54  ;;  %v4478_v15 = vld [vmem:[#allocation6 + $0x1f8] sm:$0xff]   ;;  %v4483_v19 = vld [vmem:[#allocation2 + $0x8] ss:$0 sps:$4 sm:$0x77]   ;;  %v4484_v21 = vld [vmem:[#allocation6 + $0x200] sm:$0xff]   ;;  %v770_v23 = vrot.slane %v4482_v18, 3 }
 0x14a   : > { %v803_v59 = vsel %vm786_vm9, %v794_v55, %v802_v56  ;;  %v4479_v20 = vld [vmem:[#allocation6 + $0x1b8] sm:$0xff]   ;;  %v724_v22 = vsel %vm721_vm10, %v722_v16, %v723_v17  ;;  %v771_v24 = vrot.slane %v4483_v19, 3  ;;  %v4485_v25 = vld [vmem:[%s5047_s5] sm:$0xff]   ;;  %v4487_v28 = vld [vmem:[%s5047_s5 + $0x8] sm:$0xff]  }
 0x14b   : > { %4050 = vmatpush3.bf16.msra.mxu0 %v4455_v49  ;;  %1562 = vmatprep.mubr.bf16.mxu0 %v803_v59  ;;  %v4486_v26 = vld [vmem:[#allocation6 + $0x208] sm:$0xff]   ;;  %v4488_v29 = vld [vmem:[#allocation6 + $0x210] sm:$0xff]   ;;  %v4490_v31 = vld [vmem:[#allocation6 + $0x218] sm:$0xff]  }
 0x14c   : > { %4030 = vmatpush3.bf16.msra.mxu1 %v4457_v50  ;;  %4051 = vmatprep.subr.bf16.mxu0 %v4458_v52  ;;  %v772_v27 = vsel %vm769_vm11, %v770_v23, %v771_v24  ;;  %v4489_v30 = vld [vmem:[%s5047_s5 + $0x10] sm:$0xff]   ;;  %v4491_v32 = vld [vmem:[%s5047_s5 + $0x18] sm:$0xff]   ;;  %v4493_v34 = vld [vmem:[%s5049_s7] sm:$0xff]  }
 0x14d   : > { %4031 = vmatprep.subr.bf16.mxu1 %v4460_v53  ;;  %v4492_v33 = vld [vmem:[#allocation6 + $0x220] sm:$0xff]   ;;  %v4494_v35 = vld [vmem:[#allocation6 + $0x228] sm:$0xff]   ;;  %v4496_v38 = vld [vmem:[#allocation6 + $0x230] sm:$0xff]  }
 0x14e   : > { %v4641_v36 = vld [vmem:[%s4897_s24] sm:$0xff]   ;;  %v4495_v37 = vld [vmem:[%s5049_s7 + $0x8] sm:$0xff]   ;;  %v4497_v39 = vld [vmem:[%s5049_s7 + $0x10] sm:$0xff]  }
 0x14f   : > { %4052 = vmatpush3.bf16.msra.mxu0 %v4459_v57  ;;  %v4498_v40 = vld [vmem:[#allocation6 + $0x238] sm:$0xff]   ;;  %v4500_v42 = vld [vmem:[#allocation2 + $0x4] sm:$0xff]   ;;  %v4501_v43 = vld [vmem:[#allocation8 + $0x40] sm:$0xff]  }
 0x150   : > { %4032 = vmatpush3.bf16.msra.mxu1 %v4461_v58  ;;  %4053 = vmatprep.subr.bf16.mxu0 %v4462_v60  ;;  %v4499_v41 = vld [vmem:[%s5049_s7 + $0x18] sm:$0xff]   ;;  %v4505_v47 = vld [vmem:[#allocation8 + $0x48] sm:$0xff]   ;;  %v4509_v51 = vld [vmem:[#allocation8 + $0x50] sm:$0xff]  }
 0x151   : > { %4033 = vmatprep.subr.bf16.mxu1 %v4464_v61  ;;  %v4502_v44 = vld [vmem:[#allocation8 + $0xc0] sm:$0xff]   ;;  %v4506_v48 = vld [vmem:[#allocation8 + $0xc8] sm:$0xff]   ;;  %v4510_v52 = vld [vmem:[#allocation8 + $0xd0] sm:$0xff]  }
 0x152   : > { %v4503_v45 = vld [vmem:[#allocation8] sm:$0xff]   ;;  %v4507_v49 = vld [vmem:[#allocation8 + $0x8] sm:$0xff]   ;;  %v4511_v53 = vld [vmem:[#allocation8 + $0x10] sm:$0xff]  }
 0x153   : > { %4054 = vmatpush3.bf16.msra.mxu0 %v4463_v62  ;;  %v4504_v46 = vld [vmem:[#allocation8 + $0x80] sm:$0xff]   ;;  %v4508_v50 = vld [vmem:[#allocation8 + $0x88] sm:$0xff]   ;;  %v4512_v54 = vld [vmem:[#allocation8 + $0x90] sm:$0xff]  }
 0x154   : > { %4034 = vmatpush3.bf16.msra.mxu1 %v4465_v63  ;;  %4055 = vmatprep.subr.bf16.mxu0 %v4466_v1  ;;  %v4513_v55 = vld [vmem:[#allocation8 + $0x58] sm:$0xff]   ;;  %v4517_v59 = vld [vmem:[#allocation8 + $0x60] sm:$0xff]   ;;  %v4521_v63 = vld [vmem:[#allocation8 + $0x68] sm:$0xff]  }
 0x155   : > { %4035 = vmatprep.subr.bf16.mxu1 %v4468_v2  ;;  %v4514_v56 = vld [vmem:[#allocation8 + $0xd8] sm:$0xff]   ;;  %v4518_v60 = vld [vmem:[#allocation8 + $0xe0] sm:$0xff]   ;;  %v4522_v1 = vld [vmem:[#allocation8 + $0xe8] sm:$0xff]  }
 0x156   : > { %v4515_v57 = vld [vmem:[#allocation8 + $0x18] sm:$0xff]   ;;  %v4519_v61 = vld [vmem:[#allocation8 + $0x20] sm:$0xff]   ;;  %v4523_v2 = vld [vmem:[#allocation8 + $0x28] sm:$0xff]  }
 0x157   : > { %4056 = vmatpush3.bf16.msra.mxu0 %v4467_v3  ;;  %v4516_v58 = vld [vmem:[#allocation8 + $0x98] sm:$0xff]   ;;  %v4520_v62 = vld [vmem:[#allocation8 + $0xa0] sm:$0xff]   ;;  %v4524_v3 = vld [vmem:[#allocation8 + $0xa8] sm:$0xff]  }
 0x158   : > { %4036 = vmatpush3.bf16.msra.mxu1 %v4469_v4  ;;  %4057 = vmatprep.subr.bf16.mxu0 %v4470_v5  ;;  %v4525_v4 = vld [vmem:[#allocation8 + $0x70] sm:$0xff]   ;;  %v4532_v11 = vld [vmem:[#allocation8 + $0xb8] sm:$0xff]   ;;  %v4533_v12 = vld [vmem:[#allocation8 + $0x140] sm:$0xff]  }
 0x159   : > { %4037 = vmatprep.subr.bf16.mxu1 %v4472_v6  ;;  %v4526_v5 = vld [vmem:[#allocation8 + $0xf0] sm:$0xff]  }
 0x15a   : > { %v4527_v6 = vld [vmem:[#allocation8 + $0x30] sm:$0xff]  }
 0x15b   : > { %4058 = vmatpush3.bf16.msra.mxu0 %v4471_v7  ;;  %v4528_v7 = vld [vmem:[#allocation8 + $0xb0] sm:$0xff]  }
 0x15c   : > { %4038 = vmatpush3.bf16.msra.mxu1 %v4473_v8  ;;  %4059 = vmatprep.subr.bf16.mxu0 %v4474_v9  ;;  %v4529_v8 = vld [vmem:[#allocation8 + $0x78] sm:$0xff]  }
 0x15d   : > { %4039 = vmatprep.subr.bf16.mxu1 %v4476_v10  ;;  %v4530_v9 = vld [vmem:[#allocation8 + $0xf8] sm:$0xff]  }
 0x15e   : > { %v4531_v10 = vld [vmem:[#allocation8 + $0x38] sm:$0xff]  }
 0x15f   : > { %4060 = vmatpush3.bf16.msra.mxu0 %v4475_v13  ;;  %v4534_v13 = vld [vmem:[#allocation8 + $0x1c0] sm:$0xff]  }
 0x160   : > { %4040 = vmatpush3.bf16.msra.mxu1 %v4477_v14  ;;  %4061 = vmatprep.subr.bf16.mxu0 %v4478_v15  ;;  %v3741_v15 = vld [vmem:[%s5046_s4] ss:$0 sm:$0xff] }
 0x161   : > { %4290 = vmatprep.subr.bf16.mxu1 %v4719_v0 }
 0x163   : > { %1522 = vmatmul.mubr.bf16.vlgmr.msra.gmra.mrb[4].mxu1 %v724_v22  ;;  %4062 = vmatpush3.bf16.msra.mxu0 %v4479_v20 }
 0x164   : > { %4291 = vmatpush3.bf16.msra.mxu1 %v4484_v21  ;;  %4310 = vmatprep.subr.bf16.mxu0 %v4719_v0 }
 0x165   : > { %4292 = vmatprep.subr.bf16.mxu1 %v4719_v0  ;;  %4306 = vmatprep.mubr.msk.bf16.mxu1 %vm4720_vm0, %v4719_v0 }
 0x166   : > { %1563 = vmatmul.mubr.bf16.vlgmr.msra.gmra.mrb[8].mxu0 %v772_v27 }
 0x167   : > { %4311 = vmatpush3.bf16.msra.mxu0 %v4485_v25  ;;  %4318 = vmatprep.mubr.msk.bf16.mxu0 %vm4720_vm0, %v4719_v0 }
 0x168   : > { %4293 = vmatpush3.bf16.msra.mxu1 %v4486_v26  ;;  %4312 = vmatprep.subr.bf16.mxu0 %v4719_v0 }
 0x169   : > { %4294 = vmatprep.subr.bf16.mxu1 %v4719_v0 }
 0x16b   : > { %4313 = vmatpush3.bf16.msra.mxu0 %v4487_v28 }
 0x16c   : > { %4295 = vmatpush3.bf16.msra.mxu1 %v4488_v29  ;;  %4314 = vmatprep.subr.bf16.mxu0 %v4719_v0 }
 0x16d   : > { %4296 = vmatprep.subr.bf16.mxu1 %v4719_v0 }
 0x16f   : > { %4315 = vmatpush3.bf16.msra.mxu0 %v4489_v30 }
 0x170   : > { %4297 = vmatpush3.bf16.msra.mxu1 %v4490_v31  ;;  %4316 = vmatprep.subr.bf16.mxu0 %v4719_v0 }
 0x171   : > { %4298 = vmatprep.subr.bf16.mxu1 %v4719_v0 }
 0x173   : > { %4317 = vmatpush3.bf16.msra.mxu0 %v4491_v32 }
 0x174   : > { %4299 = vmatpush3.bf16.msra.mxu1 %v4492_v33  ;;  %4322 = vmatprep.subr.bf16.mxu0 %v4719_v0 }
 0x175   : > { %4300 = vmatprep.subr.bf16.mxu1 %v4719_v0 }
 0x176   : > { %4319 = vmatmul.mubr.msk.bf16.vlgmr.msra.gmra.mrb[12].mxu0 %vm558_vm1, %v4641_v36 }
 0x177   : > { %4323 = vmatpush3.bf16.msra.mxu0 %v4493_v34  ;;  %4330 = vmatprep.mubr.msk.bf16.mxu0 %vm4720_vm0, %v4719_v0 }
 0x178   : > { %4301 = vmatpush3.bf16.msra.mxu1 %v4494_v35  ;;  %4324 = vmatprep.subr.bf16.mxu0 %v4719_v0 }
 0x179   : > { %4302 = vmatprep.subr.bf16.mxu1 %v4719_v0 }
 0x17b   : > { %4325 = vmatpush3.bf16.msra.mxu0 %v4495_v37 }
 0x17c   : > { %4303 = vmatpush3.bf16.msra.mxu1 %v4496_v38  ;;  %4326 = vmatprep.subr.bf16.mxu0 %v4719_v0 }
 0x17d   : > { %4304 = vmatprep.subr.bf16.mxu1 %v4719_v0 }
 0x17f   : > { %4327 = vmatpush3.bf16.msra.mxu0 %v4497_v39 }
 0x180   : > { %4305 = vmatpush3.bf16.msra.mxu1 %v4498_v40  ;;  %4328 = vmatprep.subr.bf16.mxu0 %v4719_v0 }
 0x181   : > { %4088 = vmatprep.subr.bf16.mxu1 %v4501_v43 }
 0x183   : > { %4307 = vmatmul.mubr.bf16.vlgmr.msra.gmra.mrb[8].mxu1 %v4500_v42  ;;  %4329 = vmatpush3.bf16.msra.mxu0 %v4499_v41 }
 0x184   : > { %4110 = vmatprep.subr.bf16.mxu0 %v4502_v44  ;;  %4089 = vmatpush3.bf16.msra.mxu1 %v4503_v45 }
 0x185   : > { %4090 = vmatprep.subr.bf16.mxu1 %v4505_v47 }
 0x186   : > { %4331 = vmatmul.mubr.msk.bf16.vlgmr.msra.gmra.mrb[16].mxu0 %vm558_vm1, %v4641_v36 }
 0x187   : > { %4111 = vmatpush3.bf16.msra.mxu0 %v4504_v46 }
 0x188   : > { %4112 = vmatprep.subr.bf16.mxu0 %v4506_v48  ;;  %4091 = vmatpush3.bf16.msra.mxu1 %v4507_v49 }
 0x189   : > { %4092 = vmatprep.subr.bf16.mxu1 %v4509_v51  ;;  %v3814_v51 = vld [vmem:[%s5048_s6] ss:$0 sm:$0xff] }
 0x18b   : > { %4113 = vmatpush3.bf16.msra.mxu0 %v4508_v50 }
 0x18c   : > { %4114 = vmatprep.subr.bf16.mxu0 %v4510_v52  ;;  %4093 = vmatpush3.bf16.msra.mxu1 %v4511_v53 }
 0x18d   : > { %4094 = vmatprep.subr.bf16.mxu1 %v4513_v55 }
 0x18f   : > { %4115 = vmatpush3.bf16.msra.mxu0 %v4512_v54 }
 0x190   : > { %4116 = vmatprep.subr.bf16.mxu0 %v4514_v56  ;;  %4095 = vmatpush3.bf16.msra.mxu1 %v4515_v57  ;;  %v3820_v57 = vld [vmem:[%s5050_s8] ss:$0 sm:$0xff] }
 0x191   : > { %4096 = vmatprep.subr.bf16.mxu1 %v4517_v59 }
 0x193   : > { %4117 = vmatpush3.bf16.msra.mxu0 %v4516_v58 }
 0x194   : > { %4118 = vmatprep.subr.bf16.mxu0 %v4518_v60  ;;  %4097 = vmatpush3.bf16.msra.mxu1 %v4519_v61 }
 0x195   : > { %4098 = vmatprep.subr.bf16.mxu1 %v4521_v63 }
 0x197   : > { %4119 = vmatpush3.bf16.msra.mxu0 %v4520_v62 }
 0x198   : > { %4120 = vmatprep.subr.bf16.mxu0 %v4522_v1  ;;  %4099 = vmatpush3.bf16.msra.mxu1 %v4523_v2 }
 0x199   : > { %4100 = vmatprep.subr.bf16.mxu1 %v4525_v4 }
 0x19b   : > { %4121 = vmatpush3.bf16.msra.mxu0 %v4524_v3 }
 0x19c   : > { %4122 = vmatprep.subr.bf16.mxu0 %v4526_v5  ;;  %4101 = vmatpush3.bf16.msra.mxu1 %v4527_v6 }
 0x19d   : > { %4102 = vmatprep.subr.bf16.mxu1 %v4529_v8 }
 0x19f   : > { %4123 = vmatpush3.bf16.msra.mxu0 %v4528_v7 }
 0x1a0   : > { %4124 = vmatprep.subr.bf16.mxu0 %v4530_v9  ;;  %4103 = vmatpush3.bf16.msra.mxu1 %v4531_v10 }
 0x1a1   : > { %4132 = vmatprep.subr.bf16.mxu1 %v4533_v12 }
 0x1a3   : > { %4125 = vmatpush3.bf16.msra.mxu0 %v4532_v11 }
 0x1a4   : > { %4154 = vmatprep.subr.bf16.mxu0 %v4534_v13 }
 0x216   : > { %v3997_v14 = vpop.f32.mrb[0].mxu1 }
 0x217   : > { %v3998_v16 = vpop.f32.mrb[1].mxu1 }
 0x218   : > { %v3999_v17 = vadd.f32 %v3998_v16, %v3997_v14  ;;  %v4000_v18 = vpop.f32.mrb[2].mxu1 }
 0x219   : > { %v4001_v19 = vpop.f32.mrb[3].mxu1  ;;  %v4019_v21 = vpop.f32.mrb[4].mxu0 }
 0x21a   : > { %v1442_v20 = vadd.f32 %v3999_v17, %v3741_v15  ;;  %v4002_v22 = vadd.f32 %v4001_v19, %v4000_v18  ;;  %v4020_v23 = vpop.f32.mrb[5].mxu0 }
 0x21b   : > { %v4021_v24 = vadd.f32 %v4020_v23, %v4019_v21  ;;  %v4022_v26 = vpop.f32.mrb[6].mxu0 }
 0x21c   : > { %v1445_v25 = vadd.f32 %v4002_v22, %v3741_v15  ;;  %v4023_v27 = vpop.f32.mrb[7].mxu0 }
 0x21d   : > { %v1483_v28 = vadd.f32 %v4021_v24, %v1442_v20  ;;  %v4024_v29 = vadd.f32 %v4023_v27, %v4022_v26 }
 0x21f   : > { %v1486_v30 = vadd.f32 %v4024_v29, %v1445_v25 }
 0x236   : > { %v4041_v31 = vpop.f32.mrb[4].mxu1 }
 0x237   : > { %v4042_v32 = vpop.f32.mrb[5].mxu1 }
 0x238   : > { %v4043_v33 = vadd.f32 %v4042_v32, %v4041_v31  ;;  %v4044_v34 = vpop.f32.mrb[6].mxu1 }
 0x239   : > { %v4045_v35 = vpop.f32.mrb[7].mxu1  ;;  %v4063_v37 = vpop.f32.mrb[8].mxu0 }
 0x23a   : > { %v1524_v36 = vadd.f32 %v4043_v33, %v1483_v28  ;;  %v4046_v38 = vadd.f32 %v4045_v35, %v4044_v34  ;;  %v4064_v39 = vpop.f32.mrb[9].mxu0 }
 0x23b   : > { %v4065_v40 = vadd.f32 %v4064_v39, %v4063_v37  ;;  %v4066_v42 = vpop.f32.mrb[10].mxu0 }
 0x23c   : > { %v1527_v41 = vadd.f32 %v4046_v38, %v1486_v30  ;;  %v4067_v43 = vpop.f32.mrb[11].mxu0 }
 0x23d   : > { %v4068_v44 = vadd.f32 %v4067_v43, %v4066_v42  ;;  %v1565_v45 = vadd.f32 %v4065_v40, %v1524_v36 }
 0x23f   : > { %v1568_v46 = vadd.f32 %v4068_v44, %v1527_v41  ;;  %v4535_v44 = vld [vmem:[#allocation8 + $0x100] sm:$0xff]  }
 0x249   : > { %v1687_v47 = vpop.f32.mrb[12].mxu0 }
 0x24a   : > { %v4320_v48 = vpop.f32.mrb[13].mxu0  ;;  %v1688_v52 = vadd.f32 %v3814_v51, %v1687_v47 }
 0x24b   : > { %v1690_v49 = vpop.f32.mrb[14].mxu0  ;;  %v4536_v48 = vld [vmem:[#allocation8 + $0x180] sm:$0xff]  }
 0x24c   : > { %v4321_v50 = vpop.f32.mrb[15].mxu0  ;;  %v1691_v54 = vadd.f32 %v3814_v51, %v1690_v49  ;;  %v1694_v59 = vmax.f32 %v1688_v52, 0.0  ;;  %v4537_v52 = vld [vmem:[#allocation8 + $0x148] sm:$0xff]  }
 0x24e   : > { %v1695_v1 = vmax.f32 %v1691_v54, 0.0 }
 0x256   : > { %v1605_v53 = vpop.f32.mrb[8].mxu1 }
 0x257   : > { %v1606_v55 = vadd.f32 %v1605_v53, %v1565_v45  ;;  %v4308_v56 = vpop.f32.mrb[9].mxu1 }
 0x258   : > { %v1608_v58 = vpop.f32.mrb[10].mxu1 }
 0x259   : > { %v1612_v60 = vmax.f32 %v1606_v55, 0.0  ;;  %v1609_v61 = vadd.f32 %v1608_v58, %v1568_v46  ;;  %v4309_v62 = vpop.f32.mrb[11].mxu1  ;;  %v1773_v63 = vpop.f32.mrb[16].mxu0 }
 0x25a   : > { %v1774_v3 = vadd.f32 %v3820_v57, %v1773_v63  ;;  %v4332_v5 = vpop.f32.mrb[17].mxu0 }
 0x25b   : > { %v1696_v2 = vadd.f32 %v1694_v59, %v1612_v60  ;;  %v1613_v4 = vmax.f32 %v1609_v61, 0.0  ;;  %v1776_v6 = vpop.f32.mrb[18].mxu0  ;;  %v4540_v5 = vld [vmem:[#allocation8 + $0x188] sm:$0xff]  }
 0x25c   : > { %v1777_v8 = vadd.f32 %v3820_v57, %v1776_v6  ;;  %v4333_v9 = vpop.f32.mrb[19].mxu0  ;;  %v1780_v10 = vmax.f32 %v1774_v3, 0.0  ;;  %v4538_v57 = vld [vmem:[#allocation8 + $0x1c8] sm:$0xff]   ;;  %v4541_v6 = vld [vmem:[#allocation8 + $0x150] sm:$0xff]  }
 0x25d   : > { %1698 = vst [vmem:[%s505_s28] sm:$0xff] %v1696_v2  ;;  %v1697_v7 = vadd.f32 %v1695_v1, %v1613_v4  ;;  %v4539_v1 = vld [vmem:[#allocation8 + $0x108] sm:$0xff]  }
 0x25e   : > { %v1781_v11 = vmax.f32 %v1777_v8, 0.0  ;;  %v4542_v8 = vld [vmem:[#allocation8 + $0x1d0] sm:$0xff]  }
 0x25f   : > { %1699 = vst [vmem:[%s505_s28 + $0x8] sm:$0xff] %v1697_v7 }
 0x260   : > { %v1784_v12 = vpack.c.bf16 %v1781_v11, %v1780_v10  ;;  %v4543_v11 = vld [vmem:[#allocation8 + $0x110] sm:$0xff]  }
 0x262   : > { %v1786_v13 = vrot.slane %v1784_v12, 4 }
 0x264   : > { %1788 = vst [vmem:[#allocation4 + $0x8] ss:$-4 sps:$4 sm:$0xff] %v1786_v13   ;;  %v4544_v13 = vld [vmem:[#allocation8 + $0x190] sm:$0xff]  }
 0x26b   : > { %v1792_v14 = vld [vmem:[#allocation4] sm:$0xff]  ;;  %v1793_v15 = vld [vmem:[#allocation4 + $0x8] sm:$0x1] }
 0x26c   : > { %v1817_v16 = vld [vmem:[#allocation4] sm:$0xfe]  ;;  %v1797_v17 = vshll.u32 %v1792_v14, 16  ;;  %v1802_v18 = vshll.u32 %v1793_v15, 16  ;;  %v1818_v19 = vld [vmem:[#allocation4 + $0x8] sm:$0x3] }
 0x26d   : > { %v1820_v20 = vshrl.u32 %v1817_v16, 16  ;;  %v1795_v21 = vshrl.u32 %v1792_v14, 16  ;;  %v1823_v22 = vshll.u32 %v1817_v16, 16  ;;  %v1828_v23 = vshrl.u32 %v1818_v19, 16  ;;  %v1808_v25 = vld [vmem:[#allocation4] sm:$0xfe] }
 0x26e   : > { %v1831_v24 = vshll.u32 %v1818_v19, 16  ;;  %v1799_v26 = vrot.slane %v1797_v17, 1  ;;  %v1804_v27 = vrot.slane %v1802_v18, 1  ;;  %v1809_v29 = vld [vmem:[#allocation4 + $0x8] sm:$0x1]  ;;  %v1812_v30 = vrot.slane %v1808_v25, 1 }
 0x26f   : > { %v1822_v28 = vrot.slane %v1820_v20, 1  ;;  %v1825_v31 = vrot.slane %v1823_v22, 2  ;;  %v1830_v32 = vrot.slane %v1828_v23, 1  ;;  %v1813_v34 = vrot.slane %v1809_v29, 1  ;;  %v1847_v35 = vld [vmem:[#allocation4] sm:$0xfc] }
 0x270   : > { %v1833_v33 = vrot.slane %v1831_v24, 2  ;;  %v1800_v36 = vor.u32 %v1799_v26, %v1795_v21  ;;  %v1848_v37 = vld [vmem:[#allocation4 + $0x8] sm:$0x7]  ;;  %v1850_v38 = vshrl.u32 %v1847_v35, 16  ;;  %v1853_v39 = vshll.u32 %v1847_v35, 16  ;;  %v4549_v18 = vld [vmem:[#allocation8 + $0x160] sm:$0xff]  }
 0x271   : > { %v1877_v40 = vld [vmem:[#allocation4] sm:$0xf8]  ;;  %v1826_v41 = vor.u32 %v1825_v31, %v1822_v28  ;;  %v1814_v43 = vsel %vm673_vm7, %v1812_v30, %v1813_v34  ;;  %v1858_v45 = vshrl.u32 %v1848_v37, 16  ;;  %v1878_v46 = vld [vmem:[#allocation4 + $0x8] sm:$0xf]  ;;  %v1861_v51 = vshll.u32 %v1848_v37, 16 }
 0x272   : > { %v1834_v42 = vor.u32 %v1833_v33, %v1830_v32  ;;  %v1805_v47 = vsel %vm647_vm5, %v1800_v36, %v1804_v27  ;;  %v1852_v49 = vrot.slane %v1850_v38, 2  ;;  %v1855_v50 = vrot.slane %v1853_v39, 3  ;;  %v4546_v15 = vld [vmem:[#allocation8 + $0x1d8] sm:$0xff]   ;;  %v4550_v19 = vld [vmem:[#allocation8 + $0x1e0] sm:$0xff]   ;;  %v4553_v22 = vld [vmem:[#allocation8 + $0x168] sm:$0xff]  }
 0x273   : > { %3166 = vmatprep.mubr.bf16.mxu1 %v1805_v47  ;;  %v1860_v54 = vrot.slane %v1858_v45, 2  ;;  %v1880_v55 = vshrl.u32 %v1877_v40, 16  ;;  %v1883_v56 = vshll.u32 %v1877_v40, 16  ;;  %v1863_v59 = vrot.slane %v1861_v51, 3  ;;  %v4547_v16 = vld [vmem:[#allocation8 + $0x118] sm:$0xff]   ;;  %v4551_v20 = vld [vmem:[#allocation8 + $0x120] sm:$0xff]  }
 0x274   : > { %v1835_v53 = vsel %vm690_vm6, %v1826_v41, %v1834_v42  ;;  %3167 = vmatmul.mubr.bf16.vlgmr.msra.gmra.mrb[12].mxu1 %v1792_v14  ;;  %v1856_v58 = vor.u32 %v1855_v50, %v1852_v49  ;;  %v1888_v60 = vshrl.u32 %v1878_v46, 16  ;;  %v1891_v61 = vshll.u32 %v1878_v46, 16  ;;  %v4545_v14 = vld [vmem:[#allocation8 + $0x158] sm:$0xff]   ;;  %v4552_v21 = vld [vmem:[#allocation8 + $0x1a0] sm:$0xff]   ;;  %v4554_v23 = vld [vmem:[#allocation8 + $0x1e8] sm:$0xff]  }
 0x275   : > { %3207 = vmatprep.mubr.bf16.mxu0 %v1835_v53  ;;  %4133 = vmatpush3.bf16.msra.mxu1 %v4535_v44  ;;  %v1882_v62 = vrot.slane %v1880_v55, 3  ;;  %v1885_v63 = vrot.slane %v1883_v56, 4  ;;  %v1864_v2 = vor.u32 %v1863_v59, %v1860_v54  ;;  %v4548_v17 = vld [vmem:[#allocation8 + $0x198] sm:$0xff]   ;;  %v4555_v24 = vld [vmem:[#allocation8 + $0x128] sm:$0xff]   ;;  %v4557_v26 = vld [vmem:[#allocation8 + $0x170] sm:$0xff]   ;;  %vm1997_vm5 = vcmask 1040384  }
 0x276   : > { %3208 = vmatmul.mubr.bf16.vlgmr.msra.gmra.mrb[20].mxu0 %v1814_v43  ;;  %v1890_v3 = vrot.slane %v1888_v60, 3  ;;  %v1893_v4 = vrot.slane %v1891_v61, 4  ;;  %4134 = vmatprep.subr.bf16.mxu1 %v4537_v52  ;;  %v4556_v25 = vld [vmem:[#allocation8 + $0x1a8] sm:$0xff]   ;;  %v1908_v27 = vld [vmem:[#allocation4] sm:$0xf0]  ;;  %v4561_v38 = vld [vmem:[#allocation8 + $0x178] sm:$0xff]  }
 0x277   : > { %4155 = vmatpush3.bf16.msra.mxu0 %v4536_v48  ;;  %v1886_v7 = vor.u32 %v1885_v63, %v1882_v62  ;;  %v1865_v9 = vsel %vm738_vm8, %v1856_v58, %v1864_v2  ;;  %v1909_v28 = vld [vmem:[#allocation4 + $0x8] sm:$0x1f]  ;;  %v4558_v29 = vld [vmem:[#allocation8 + $0x1f0] sm:$0xff]   ;;  %v1912_v33 = vshrl.u32 %v1908_v27, 16  ;;  %v1915_v34 = vshll.u32 %v1908_v27, 16  ;;  %v4565_v54 = vld [vmem:[#allocation8 + $0x240] sm:$0xff]  }
 0x278   : > { %4156 = vmatprep.subr.bf16.mxu0 %v4538_v57  ;;  %v1894_v10 = vor.u32 %v1893_v4, %v1890_v3  ;;  %3248 = vmatprep.mubr.bf16.mxu1 %v1865_v9  ;;  %v1940_v30 = vld [vmem:[#allocation4] sm:$0xe0]  ;;  %v1941_v31 = vld [vmem:[#allocation4 + $0x8] sm:$0x3f]  ;;  %v1920_v35 = vshrl.u32 %v1909_v28, 16  ;;  %v1923_v36 = vshll.u32 %v1909_v28, 16 }
 0x279   : > { %4135 = vmatpush3.bf16.msra.mxu1 %v4539_v1  ;;  %v4559_v32 = vld [vmem:[#allocation8 + $0x130] sm:$0xff]   ;;  %v1944_v39 = vshrl.u32 %v1940_v30, 16  ;;  %v1947_v40 = vshll.u32 %v1940_v30, 16  ;;  %v1952_v41 = vshrl.u32 %v1941_v31, 16  ;;  %v1955_v42 = vshll.u32 %v1941_v31, 16  ;;  %v4562_v43 = vld [vmem:[#allocation8 + $0x1f8] sm:$0xff]  }
 0x27a   : > { %v1895_v12 = vsel %vm786_vm9, %v1886_v7, %v1894_v10  ;;  %4136 = vmatprep.subr.bf16.mxu1 %v4541_v6  ;;  %v4560_v37 = vld [vmem:[#allocation8 + $0x1b0] sm:$0xff]   ;;  %v4563_v44 = vld [vmem:[#allocation8 + $0x138] sm:$0xff]   ;;  %v1914_v49 = vrot.slane %v1912_v33, 4  ;;  %v1917_v50 = vrot.slane %v1915_v34, 5  ;;  %v1922_v51 = vrot.slane %v1920_v35, 4  ;;  %v4566_v61 = vld [vmem:[#allocation8 + $0x2c0] sm:$0xff]  }
 0x27b   : > { %4157 = vmatpush3.bf16.msra.mxu0 %v4540_v5  ;;  %3289 = vmatprep.mubr.bf16.mxu0 %v1895_v12  ;;  %v1838_v45 = vld [vmem:[#allocation4] sm:$0xfc]  ;;  %v1839_v46 = vld [vmem:[#allocation4 + $0x8] sm:$0x3]  ;;  %v1925_v52 = vrot.slane %v1923_v36, 5  ;;  %v1946_v55 = vrot.slane %v1944_v39, 5 }
 0x27c   : > { %4158 = vmatprep.subr.bf16.mxu0 %v4542_v8  ;;  %v1868_v47 = vld [vmem:[#allocation4] sm:$0xf8]  ;;  %v1869_v48 = vld [vmem:[#allocation4 + $0x8] sm:$0x7]  ;;  %v1949_v56 = vrot.slane %v1947_v40, 6  ;;  %v1954_v57 = vrot.slane %v1952_v41, 5  ;;  %v1918_v2 = vor.u32 %v1917_v50, %v1914_v49 }
 0x27d   : > { %4137 = vmatpush3.bf16.msra.mxu1 %v4543_v11  ;;  %v4564_v53 = vld [vmem:[#allocation8 + $0x1b8] sm:$0xff]   ;;  %v1957_v58 = vrot.slane %v1955_v42, 6  ;;  %v1842_v59 = vrot.slane %v1838_v45, 2  ;;  %v1843_v60 = vrot.slane %v1839_v46, 2  ;;  %v1872_v62 = vrot.slane %v1868_v47, 3  ;;  %v4567_v1 = vld [vmem:[#allocation8 + $0x200] sm:$0xff]  }
 0x27e   : > { %4138 = vmatprep.subr.bf16.mxu1 %v4545_v14  ;;  %v1873_v63 = vrot.slane %v1869_v48, 3  ;;  %v1926_v3 = vor.u32 %v1925_v52, %v1922_v51  ;;  %v4568_v4 = vld [vmem:[#allocation8 + $0x280] sm:$0xff]   ;;  %v1950_v5 = vor.u32 %v1949_v56, %v1946_v55  ;;  %v4569_v8 = vld [vmem:[#allocation8 + $0x248] sm:$0xff]   ;;  %v4589_v31 = vld [vmem:[#allocation8 + $0x270] sm:$0xff]  }
 0x27f   : > { %4159 = vmatpush3.bf16.msra.mxu0 %v4544_v13  ;;  %v1958_v6 = vor.u32 %v1957_v58, %v1954_v57  ;;  %v1844_v7 = vsel %vm721_vm10, %v1842_v59, %v1843_v60  ;;  %v4570_v10 = vld [vmem:[#allocation8 + $0x2c8] sm:$0xff]   ;;  %v1972_v33 = vld [vmem:[#allocation4 + $0x8] sm:$0x7f]  ;;  %v4590_v34 = vld [vmem:[#allocation8 + $0x2f0] sm:$0xff]  }
 0x280   : > { %4160 = vmatprep.subr.bf16.mxu0 %v4546_v15  ;;  %v1874_v9 = vsel %vm769_vm11, %v1872_v62, %v1873_v63  ;;  %v1927_v11 = vsel %vm1910_vm12, %v1918_v2, %v1926_v3  ;;  %v4571_v12 = vld [vmem:[#allocation8 + $0x208] sm:$0xff]   ;;  %v4573_v15 = vld [vmem:[#allocation8 + $0x250] sm:$0xff]   ;;  %v4991_v35 = vld [vmem:[#allocation4 + $0x8] sm:$0xff]  ;;  %v1983_v39 = vshrl.u32 %v1972_v33, 16  ;;  %v1986_v40 = vshll.u32 %v1972_v33, 16 }
 0x281   : > { %4139 = vmatpush3.bf16.msra.mxu1 %v4547_v16  ;;  %v1959_v13 = vsel %vm1942_vm13, %v1950_v5, %v1958_v6  ;;  %v4572_v14 = vld [vmem:[#allocation8 + $0x288] sm:$0xff]   ;;  %v4574_v16 = vld [vmem:[#allocation8 + $0x2d0] sm:$0xff]   ;;  %v4593_v42 = vld [vmem:[#allocation8 + $0x278] sm:$0xff]  }
 0x282   : > { %4140 = vmatprep.subr.bf16.mxu1 %v4549_v18  ;;  %v4576_v18 = vld [vmem:[#allocation8 + $0x290] sm:$0xff]   ;;  %v4585_v27 = vld [vmem:[#allocation8 + $0x268] sm:$0xff]   ;;  %v4595_v45 = vld [vmem:[#allocation8 + $0x238] sm:$0xff]   ;;  %v1985_v52 = vrot.slane %v1983_v39, 6 }
 0x283   : > { %4161 = vmatpush3.bf16.msra.mxu0 %v4548_v17  ;;  %v4575_v17 = vld [vmem:[#allocation8 + $0x210] sm:$0xff]   ;;  %v4586_v28 = vld [vmem:[#allocation8 + $0x2e8] sm:$0xff]   ;;  %v1899_v47 = vld [vmem:[#allocation4 + $0x8] sm:$0xf] }
 0x284   : > { %4162 = vmatprep.subr.bf16.mxu0 %v4550_v19  ;;  %v4577_v19 = vld [vmem:[#allocation8 + $0x258] sm:$0xff]   ;;  %v4588_v30 = vld [vmem:[#allocation8 + $0x2a8] sm:$0xff]   ;;  %v4591_v36 = vld [vmem:[#allocation8 + $0x230] sm:$0xff]   ;;  %v1904_v59 = vrot.slane %v1899_v47, 4 }
 0x285   : > { %4141 = vmatpush3.bf16.msra.mxu1 %v4551_v20  ;;  %v4578_v20 = vld [vmem:[#allocation8 + $0x2d8] sm:$0xff]   ;;  %v4592_v41 = vld [vmem:[#allocation8 + $0x2b0] sm:$0xff]   ;;  %v4597_v56 = vld [vmem:[#allocation8 + $0x340] sm:$0xff]  }
 0x286   : > { %4142 = vmatprep.subr.bf16.mxu1 %v4553_v22  ;;  %v4580_v22 = vld [vmem:[#allocation8 + $0x298] sm:$0xff]   ;;  %v1898_v46 = vld [vmem:[#allocation4] sm:$0xf0]  ;;  %v4598_v60 = vld [vmem:[#allocation8 + $0x3c0] sm:$0xff]  }
 0x287   : > { %4163 = vmatpush3.bf16.msra.mxu0 %v4552_v21  ;;  %v4579_v21 = vld [vmem:[#allocation8 + $0x218] sm:$0xff]   ;;  %v1930_v48 = vld [vmem:[#allocation4] sm:$0xe0]  ;;  %v1903_v58 = vrot.slane %v1898_v46, 4  ;;  %v4599_v2 = vld [vmem:[#allocation8 + $0x300] sm:$0xff]  }
 0x288   : > { %4164 = vmatprep.subr.bf16.mxu0 %v4554_v23  ;;  %v4581_v23 = vld [vmem:[#allocation8 + $0x260] sm:$0xff]   ;;  %v1931_v49 = vld [vmem:[#allocation4 + $0x8] sm:$0x1f]  ;;  %v4622_v33 = vld [vmem:[#allocation8 + $0x3f0] sm:$0xff]  }
 0x289   : > { %4143 = vmatpush3.bf16.msra.mxu1 %v4555_v24  ;;  %v4582_v24 = vld [vmem:[#allocation8 + $0x2e0] sm:$0xff]   ;;  %v4596_v55 = vld [vmem:[#allocation8 + $0x2b8] sm:$0xff]   ;;  %v1936_v62 = vrot.slane %v1931_v49, 5  ;;  %v1962_v39 = vld [vmem:[#allocation4] sm:$0xc0] }
 0x28a   : > { %4144 = vmatprep.subr.bf16.mxu1 %v4557_v26  ;;  %v4584_v26 = vld [vmem:[#allocation8 + $0x2a0] sm:$0xff]  }
 0x28b   : > { %4165 = vmatpush3.bf16.msra.mxu0 %v4556_v25  ;;  %v4583_v25 = vld [vmem:[#allocation8 + $0x220] sm:$0xff]  }
 0x28c   : > { %4166 = vmatprep.subr.bf16.mxu0 %v4558_v29  ;;  %v4587_v29 = vld [vmem:[#allocation8 + $0x228] sm:$0xff]   ;;  %v4600_v5 = vld [vmem:[#allocation8 + $0x380] sm:$0xff]  }
 0x28d   : > { %4145 = vmatpush3.bf16.msra.mxu1 %v4559_v32  ;;  %v1971_v32 = vld [vmem:[#allocation4] sm:$0xc0]  ;;  %v4629_v49 = vld [vmem:[#allocation8 + $0x400] sm:$0xff]  }
 0x28e   : > { %4146 = vmatprep.subr.bf16.mxu1 %v4561_v38  ;;  %v1978_v38 = vshll.u32 %v1971_v32, 16 }
 0x28f   : > { %4167 = vmatpush3.bf16.msra.mxu0 %v4560_v37  ;;  %v1975_v37 = vshrl.u32 %v1971_v32, 16  ;;  %v4621_v32 = vld [vmem:[#allocation8 + $0x370] sm:$0xff]  }
 0x290   : > { %4168 = vmatprep.subr.bf16.mxu0 %v4562_v43  ;;  %v2011_v43 = vshrl.u32 %v4991_v35, 16  ;;  %v1980_v51 = vrot.slane %v1978_v38, 7  ;;  %v4626_v38 = vld [vmem:[#allocation8 + $0x3f8] sm:$0xff]  }
 0x291   : > { %4147 = vmatpush3.bf16.msra.mxu1 %v4563_v44  ;;  %v4594_v44 = vld [vmem:[#allocation8 + $0x2f8] sm:$0xff]   ;;  %v1977_v50 = vrot.slane %v1975_v37, 6 }
 0x292   : > { %4176 = vmatprep.subr.bf16.mxu1 %v4565_v54  ;;  %v2003_v54 = vld [vmem:[#allocation4] sm:$0x80]  ;;  %v2013_v57 = vrot.slane %v2011_v43, 7  ;;  %v4625_v37 = vld [vmem:[#allocation8 + $0x378] sm:$0xff]  }
 0x293   : > { %4169 = vmatpush3.bf16.msra.mxu0 %v4564_v53  ;;  %v1988_v53 = vrot.slane %v1986_v40, 7  ;;  %v2007_v63 = vshrl.u32 %v2003_v54, 16  ;;  %v1981_v3 = vor.u32 %v1980_v51, %v1977_v50  ;;  %v1963_v40 = vld [vmem:[#allocation4 + $0x8] sm:$0x3f]  ;;  %v4633_v50 = vld [vmem:[%s5053_s11] sm:$0xff]   ;;  %v4635_v54 = vld [vmem:[%s5053_s11 + $0x8] sm:$0xff]  }
 0x294   : > { %4198 = vmatprep.subr.bf16.mxu0 %v4566_v61  ;;  %3249 = vmatmul.mubr.bf16.vlgmr.msra.gmra.mrb[16].mxu1 %v1844_v7  ;;  %v1935_v61 = vrot.slane %v1930_v48, 5  ;;  %v1905_v7 = vsel %vm1902_vm14, %v1903_v58, %v1904_v59  ;;  %v1994_v43 = vld [vmem:[#allocation4 + $0x8] sm:$0x7f]  ;;  %v1967_v46 = vrot.slane %v1963_v40, 6  ;;  %v4634_v59 = vld [vmem:[#allocation8 + $0x420] sm:$0xff]  }
 0x295   : > { %4177 = vmatpush3.bf16.msra.mxu1 %v4567_v1  ;;  %3330 = vmatprep.mubr.bf16.mxu1 %v1927_v11  ;;  %v2014_v1 = vshll.u32 %v4991_v35, 16  ;;  %v4602_v11 = vld [vmem:[#allocation8 + $0x3c8] sm:$0xff]   ;;  %v1999_v48 = vrot.slane %v1994_v43, 7  ;;  %v4639_v58 = vld [vmem:[%s5053_s11 + $0x18] sm:$0xff]  }
 0x296   : > { %3290 = vmatmul.mubr.bf16.vlgmr.msra.gmra.mrb[24].mxu0 %v1874_v9  ;;  %4178 = vmatprep.subr.bf16.mxu1 %v4569_v8  ;;  %v4601_v8 = vld [vmem:[#allocation8 + $0x348] sm:$0xff]   ;;  %v1937_v9 = vsel %vm1934_vm15, %v1935_v61, %v1936_v62  ;;  %v4638_v62 = vld [vmem:[#allocation8 + $0x430] sm:$0xff]  }
 0x297   : > { %4199 = vmatpush3.bf16.msra.mxu0 %v4568_v4  ;;  %3371 = vmatprep.mubr.bf16.mxu0 %v1959_v13  ;;  %v1989_v4 = vor.u32 %v1988_v53, %v1985_v52  ;;  %v2016_v6 = vor.u32 %v2014_v1, %v2013_v57  ;;  %v4603_v13 = vld [vmem:[#allocation8 + $0x308] sm:$0xff]   ;;  %v4632_v57 = vld [vmem:[#allocation8 + $0x418] sm:$0xff]  }
 0x298   : > { %4200 = vmatprep.subr.bf16.mxu0 %v4570_v10  ;;  %v2009_v10 = vrot.slane %v2007_v63, 7  ;;  %v4630_v53 = vld [vmem:[#allocation8 + $0x408] sm:$0xff]   ;;  %v4640_v63 = vld [vmem:[#allocation8 + $0x438] sm:$0xff]  }
 0x299   : > { %4179 = vmatpush3.bf16.msra.mxu1 %v4571_v12  ;;  %v1990_v12 = vsel %vm1973_vm3, %v1981_v3, %v1989_v4  ;;  %v4642_v61 = vld [vmem:[%s4897_s24] sm:$0xff]  }
 0x29a   : > { %4180 = vmatprep.subr.bf16.mxu1 %v4573_v15  ;;  %v4604_v15 = vld [vmem:[#allocation8 + $0x388] sm:$0xff]   ;;  %v3826_v3 = vld [vmem:[%s5052_s10] ss:$0 sm:$0xff] }
 0x29b   : > { %4201 = vmatpush3.bf16.msra.mxu0 %v4572_v14  ;;  %v2017_v14 = vsel %vm2005_vm4, %v2009_v10, %v2016_v6 }
 0x29c   : > { %4202 = vmatprep.subr.bf16.mxu0 %v4574_v16  ;;  %v4605_v16 = vld [vmem:[#allocation8 + $0x350] sm:$0xff]  }
 0x29d   : > { %4181 = vmatpush3.bf16.msra.mxu1 %v4575_v17  ;;  %v4606_v17 = vld [vmem:[#allocation8 + $0x3d0] sm:$0xff]  }
 0x29e   : > { %4182 = vmatprep.subr.bf16.mxu1 %v4577_v19  ;;  %v4608_v19 = vld [vmem:[#allocation8 + $0x390] sm:$0xff]  }
 0x29f   : > { %4203 = vmatpush3.bf16.msra.mxu0 %v4576_v18  ;;  %v4607_v18 = vld [vmem:[#allocation8 + $0x310] sm:$0xff]  }
 0x2a0   : > { %4204 = vmatprep.subr.bf16.mxu0 %v4578_v20  ;;  %v4609_v20 = vld [vmem:[#allocation8 + $0x358] sm:$0xff]  }
 0x2a1   : > { %4183 = vmatpush3.bf16.msra.mxu1 %v4579_v21  ;;  %v4610_v21 = vld [vmem:[#allocation8 + $0x3d8] sm:$0xff]  }
 0x2a2   : > { %4184 = vmatprep.subr.bf16.mxu1 %v4581_v23  ;;  %v4612_v23 = vld [vmem:[#allocation8 + $0x398] sm:$0xff]  }
 0x2a3   : > { %4205 = vmatpush3.bf16.msra.mxu0 %v4580_v22  ;;  %v4611_v22 = vld [vmem:[#allocation8 + $0x318] sm:$0xff]  }
 0x2a4   : > { %4206 = vmatprep.subr.bf16.mxu0 %v4582_v24  ;;  %v4613_v24 = vld [vmem:[#allocation8 + $0x360] sm:$0xff]  }
 0x2a5   : > { %4185 = vmatpush3.bf16.msra.mxu1 %v4583_v25  ;;  %v4614_v25 = vld [vmem:[#allocation8 + $0x3e0] sm:$0xff]  }
 0x2a6   : > { %4186 = vmatprep.subr.bf16.mxu1 %v4585_v27  ;;  %v4616_v27 = vld [vmem:[#allocation8 + $0x3a0] sm:$0xff]  }
 0x2a7   : > { %4207 = vmatpush3.bf16.msra.mxu0 %v4584_v26  ;;  %v4615_v26 = vld [vmem:[#allocation8 + $0x320] sm:$0xff]  }
 0x2a8   : > { %4208 = vmatprep.subr.bf16.mxu0 %v4586_v28  ;;  %v4617_v28 = vld [vmem:[#allocation8 + $0x368] sm:$0xff]  }
 0x2a9   : > { %4187 = vmatpush3.bf16.msra.mxu1 %v4587_v29  ;;  %v4618_v29 = vld [vmem:[#allocation8 + $0x3e8] sm:$0xff]  }
 0x2aa   : > { %4188 = vmatprep.subr.bf16.mxu1 %v4589_v31  ;;  %v4620_v31 = vld [vmem:[#allocation8 + $0x3a8] sm:$0xff]  }
 0x2ab   : > { %4209 = vmatpush3.bf16.msra.mxu0 %v4588_v30  ;;  %v4619_v30 = vld [vmem:[#allocation8 + $0x328] sm:$0xff]  }
 0x2ac   : > { %4210 = vmatprep.subr.bf16.mxu0 %v4590_v34  ;;  %v4623_v34 = vld [vmem:[#allocation8 + $0x330] sm:$0xff]  }
 0x2ad   : > { %4189 = vmatpush3.bf16.msra.mxu1 %v4591_v36  ;;  %v4624_v36 = vld [vmem:[#allocation8 + $0x3b0] sm:$0xff]  }
 0x2ae   : > { %4190 = vmatprep.subr.bf16.mxu1 %v4593_v42  ;;  %v1993_v42 = vld [vmem:[#allocation4] sm:$0x80] }
 0x2af   : > { %4211 = vmatpush3.bf16.msra.mxu0 %v4592_v41  ;;  %v4627_v41 = vld [vmem:[#allocation8 + $0x338] sm:$0xff]   ;;  %v1998_v47 = vrot.slane %v1993_v42, 7 }
 0x2b0   : > { %4212 = vmatprep.subr.bf16.mxu0 %v4594_v44  ;;  %v4628_v44 = vld [vmem:[#allocation8 + $0x3b8] sm:$0xff]  }
 0x2b1   : > { %4191 = vmatpush3.bf16.msra.mxu1 %v4595_v45  ;;  %v1966_v45 = vrot.slane %v1962_v39, 6  ;;  %v2000_v52 = vsel %vm1997_vm5, %v1998_v47, %v1999_v48 }
 0x2b2   : > { %4220 = vmatprep.subr.bf16.mxu1 %v4597_v56  ;;  %v4637_v56 = vld [vmem:[%s5053_s11 + $0x10] sm:$0xff]  }
 0x2b3   : > { %4213 = vmatpush3.bf16.msra.mxu0 %v4596_v55  ;;  %v1968_v51 = vsel %vm613_vm2, %v1966_v45, %v1967_v46  ;;  %v4631_v55 = vld [vmem:[#allocation8 + $0x410] sm:$0xff]  }
 0x2b4   : > { %4242 = vmatprep.subr.bf16.mxu0 %v4598_v60  ;;  %3331 = vmatmul.mubr.bf16.vlgmr.msra.gmra.mrb[20].mxu1 %v1905_v7  ;;  %v4636_v60 = vld [vmem:[#allocation8 + $0x428] sm:$0xff]  }
 0x2b5   : > { %4221 = vmatpush3.bf16.msra.mxu1 %v4599_v2  ;;  %3412 = vmatprep.mubr.bf16.mxu1 %v1990_v12 }
 0x2b6   : > { %3372 = vmatmul.mubr.bf16.vlgmr.msra.gmra.mrb[28].mxu0 %v1937_v9  ;;  %4222 = vmatprep.subr.bf16.mxu1 %v4601_v8 }
 0x2b7   : > { %4243 = vmatpush3.bf16.msra.mxu0 %v4600_v5  ;;  %3453 = vmatprep.mubr.bf16.mxu0 %v2017_v14 }
 0x2b8   : > { %4244 = vmatprep.subr.bf16.mxu0 %v4602_v11 }
 0x2b9   : > { %4223 = vmatpush3.bf16.msra.mxu1 %v4603_v13 }
 0x2ba   : > { %4224 = vmatprep.subr.bf16.mxu1 %v4605_v16 }
 0x2bb   : > { %4245 = vmatpush3.bf16.msra.mxu0 %v4604_v15 }
 0x2bc   : > { %4246 = vmatprep.subr.bf16.mxu0 %v4606_v17 }
 0x2bd   : > { %4225 = vmatpush3.bf16.msra.mxu1 %v4607_v18 }
 0x2be   : > { %4226 = vmatprep.subr.bf16.mxu1 %v4609_v20 }
 0x2bf   : > { %4247 = vmatpush3.bf16.msra.mxu0 %v4608_v19 }
 0x2c0   : > { %4248 = vmatprep.subr.bf16.mxu0 %v4610_v21 }
 0x2c1   : > { %4227 = vmatpush3.bf16.msra.mxu1 %v4611_v22 }
 0x2c2   : > { %4228 = vmatprep.subr.bf16.mxu1 %v4613_v24 }
 0x2c3   : > { %4249 = vmatpush3.bf16.msra.mxu0 %v4612_v23 }
 0x2c4   : > { %4250 = vmatprep.subr.bf16.mxu0 %v4614_v25 }
 0x2c5   : > { %4229 = vmatpush3.bf16.msra.mxu1 %v4615_v26 }
 0x2c6   : > { %4230 = vmatprep.subr.bf16.mxu1 %v4617_v28 }
 0x2c7   : > { %4251 = vmatpush3.bf16.msra.mxu0 %v4616_v27 }
 0x2c8   : > { %4252 = vmatprep.subr.bf16.mxu0 %v4618_v29 }
 0x2c9   : > { %4231 = vmatpush3.bf16.msra.mxu1 %v4619_v30 }
 0x2ca   : > { %4232 = vmatprep.subr.bf16.mxu1 %v4621_v32 }
 0x2cb   : > { %4253 = vmatpush3.bf16.msra.mxu0 %v4620_v31 }
 0x2cc   : > { %4254 = vmatprep.subr.bf16.mxu0 %v4622_v33 }
 0x2cd   : > { %4233 = vmatpush3.bf16.msra.mxu1 %v4623_v34 }
 0x2ce   : > { %4234 = vmatprep.subr.bf16.mxu1 %v4625_v37 }
 0x2cf   : > { %4255 = vmatpush3.bf16.msra.mxu0 %v4624_v36 }
 0x2d0   : > { %4256 = vmatprep.subr.bf16.mxu0 %v4626_v38 }
 0x2d1   : > { %4235 = vmatpush3.bf16.msra.mxu1 %v4627_v41 }
 0x2d2   : > { %4334 = vmatprep.subr.bf16.mxu1 %v4719_v0 }
 0x2d3   : > { %4257 = vmatpush3.bf16.msra.mxu0 %v4628_v44 }
 0x2d4   : > { %4354 = vmatprep.subr.bf16.mxu0 %v4719_v0  ;;  %3413 = vmatmul.mubr.bf16.vlgmr.msra.gmra.mrb[24].mxu1 %v1968_v51 }
 0x2d5   : > { %4335 = vmatpush3.bf16.msra.mxu1 %v4629_v49  ;;  %4350 = vmatprep.mubr.msk.bf16.mxu1 %vm4720_vm0, %v4719_v0 }
 0x2d6   : > { %3454 = vmatmul.mubr.bf16.vlgmr.msra.gmra.mrb[32].mxu0 %v2000_v52  ;;  %4336 = vmatprep.subr.bf16.mxu1 %v4719_v0 }
 0x2d7   : > { %4355 = vmatpush3.bf16.msra.mxu0 %v4633_v50  ;;  %4362 = vmatprep.mubr.msk.bf16.mxu0 %vm4720_vm0, %v4719_v0 }
 0x2d8   : > { %4356 = vmatprep.subr.bf16.mxu0 %v4719_v0 }
 0x2d9   : > { %4337 = vmatpush3.bf16.msra.mxu1 %v4630_v53 }
 0x2da   : > { %4338 = vmatprep.subr.bf16.mxu1 %v4719_v0 }
 0x2db   : > { %4357 = vmatpush3.bf16.msra.mxu0 %v4635_v54 }
 0x2dc   : > { %4358 = vmatprep.subr.bf16.mxu0 %v4719_v0 }
 0x2dd   : > { %4339 = vmatpush3.bf16.msra.mxu1 %v4631_v55 }
 0x2de   : > { %4340 = vmatprep.subr.bf16.mxu1 %v4719_v0 }
 0x2df   : > { %4359 = vmatpush3.bf16.msra.mxu0 %v4637_v56 }
 0x2e0   : > { %4360 = vmatprep.subr.bf16.mxu0 %v4719_v0 }
 0x2e1   : > { %4341 = vmatpush3.bf16.msra.mxu1 %v4632_v57 }
 0x2e2   : > { %4342 = vmatprep.subr.bf16.mxu1 %v4719_v0 }
 0x2e3   : > { %4361 = vmatpush3.bf16.msra.mxu0 %v4639_v58 }
 0x2e5   : > { %4343 = vmatpush3.bf16.msra.mxu1 %v4634_v59 }
 0x2e6   : > { %4363 = vmatmul.mubr.msk.bf16.vlgmr.msra.gmra.mrb[36].mxu0 %vm558_vm1, %v4642_v61  ;;  %4344 = vmatprep.subr.bf16.mxu1 %v4719_v0 }
 0x2e9   : > { %4345 = vmatpush3.bf16.msra.mxu1 %v4636_v60 }
 0x2ea   : > { %4346 = vmatprep.subr.bf16.mxu1 %v4719_v0 }
 0x2ed   : > { %4347 = vmatpush3.bf16.msra.mxu1 %v4638_v62 }
 0x2ee   : > { %4348 = vmatprep.subr.bf16.mxu1 %v4719_v0 }
 0x2f1   : > { %4349 = vmatpush3.bf16.msra.mxu1 %v4640_v63 }
 0x2f4   : > { %4351 = vmatmul.mubr.bf16.vlgmr.msra.gmra.mrb[28].mxu1 %v4991_v35 }
 0x347   : > { %v4104_v1 = vpop.f32.mrb[12].mxu1 }
 0x348   : > { %v4105_v4 = vpop.f32.mrb[13].mxu1 }
 0x349   : > { %v4126_v2 = vpop.f32.mrb[20].mxu0  ;;  %v4106_v5 = vadd.f32 %v4105_v4, %v4104_v1  ;;  %v4107_v7 = vpop.f32.mrb[14].mxu1 }
 0x34a   : > { %v4127_v6 = vpop.f32.mrb[21].mxu0  ;;  %v4108_v10 = vpop.f32.mrb[15].mxu1 }
 0x34b   : > { %v4128_v8 = vadd.f32 %v4127_v6, %v4126_v2  ;;  %v4129_v9 = vpop.f32.mrb[22].mxu0  ;;  %v3169_v11 = vadd.f32 %v4106_v5, %v3826_v3  ;;  %v4109_v12 = vadd.f32 %v4108_v10, %v4107_v7  ;;  %v3963_v6 = vld [vmem:[%s5054_s12] ss:$0 sm:$0xff] }
 0x34c   : > { %v4130_v13 = vpop.f32.mrb[23].mxu0 }
 0x34d   : > { %v4131_v0 = vadd.f32 %v4130_v13, %v4129_v9  ;;  %v3210_v14 = vadd.f32 %v4128_v8, %v3169_v11  ;;  %v3172_v15 = vadd.f32 %v4109_v12, %v3826_v3 }
 0x34f   : > { %v3213_v35 = vadd.f32 %v4131_v0, %v3172_v15 }
 0x367   : > { %v4148_v16 = vpop.f32.mrb[16].mxu1 }
 0x368   : > { %v4149_v18 = vpop.f32.mrb[17].mxu1 }
 0x369   : > { %v4170_v17 = vpop.f32.mrb[24].mxu0  ;;  %v4150_v19 = vadd.f32 %v4149_v18, %v4148_v16  ;;  %v4151_v21 = vpop.f32.mrb[18].mxu1 }
 0x36a   : > { %v4171_v20 = vpop.f32.mrb[25].mxu0  ;;  %v4152_v24 = vpop.f32.mrb[19].mxu1 }
 0x36b   : > { %v4172_v22 = vadd.f32 %v4171_v20, %v4170_v17  ;;  %v4173_v23 = vpop.f32.mrb[26].mxu0  ;;  %v3251_v25 = vadd.f32 %v4150_v19, %v3210_v14  ;;  %v4153_v26 = vadd.f32 %v4152_v24, %v4151_v21 }
 0x36c   : > { %v4174_v27 = vpop.f32.mrb[27].mxu0 }
 0x36d   : > { %v4175_v28 = vadd.f32 %v4174_v27, %v4173_v23  ;;  %v3292_v29 = vadd.f32 %v4172_v22, %v3251_v25  ;;  %v3254_v30 = vadd.f32 %v4153_v26, %v3213_v35 }
 0x36f   : > { %v3295_v31 = vadd.f32 %v4175_v28, %v3254_v30 }
 0x387   : > { %v4192_v32 = vpop.f32.mrb[20].mxu1 }
 0x388   : > { %v4193_v34 = vpop.f32.mrb[21].mxu1 }
 0x389   : > { %v4214_v33 = vpop.f32.mrb[28].mxu0  ;;  %v4194_v36 = vadd.f32 %v4193_v34, %v4192_v32  ;;  %v4195_v38 = vpop.f32.mrb[22].mxu1 }
 0x38a   : > { %v4215_v37 = vpop.f32.mrb[29].mxu0  ;;  %v4196_v41 = vpop.f32.mrb[23].mxu1 }
 0x38b   : > { %v4216_v39 = vadd.f32 %v4215_v37, %v4214_v33  ;;  %v4217_v40 = vpop.f32.mrb[30].mxu0  ;;  %v3333_v42 = vadd.f32 %v4194_v36, %v3292_v29  ;;  %v4197_v43 = vadd.f32 %v4196_v41, %v4195_v38 }
 0x38c   : > { %v4218_v44 = vpop.f32.mrb[31].mxu0 }
 0x38d   : > { %v4219_v45 = vadd.f32 %v4218_v44, %v4217_v40  ;;  %v3374_v46 = vadd.f32 %v4216_v39, %v3333_v42  ;;  %v3336_v47 = vadd.f32 %v4197_v43, %v3295_v31 }
 0x38f   : > { %v3377_v48 = vadd.f32 %v4219_v45, %v3336_v47 }
 0x3a7   : > { %v4236_v49 = vpop.f32.mrb[24].mxu1 }
 0x3a8   : > { %v4237_v51 = vpop.f32.mrb[25].mxu1 }
 0x3a9   : > { %v4258_v50 = vpop.f32.mrb[32].mxu0  ;;  %v4238_v52 = vadd.f32 %v4237_v51, %v4236_v49  ;;  %v4239_v54 = vpop.f32.mrb[26].mxu1 }
 0x3aa   : > { %v4259_v53 = vpop.f32.mrb[33].mxu0  ;;  %v4240_v57 = vpop.f32.mrb[27].mxu1 }
 0x3ab   : > { %v4260_v55 = vadd.f32 %v4259_v53, %v4258_v50  ;;  %v4261_v56 = vpop.f32.mrb[34].mxu0  ;;  %v3415_v58 = vadd.f32 %v4238_v52, %v3374_v46  ;;  %v4241_v59 = vadd.f32 %v4240_v57, %v4239_v54 }
 0x3ac   : > { %v4262_v60 = vpop.f32.mrb[35].mxu0 }
 0x3ad   : > { %v4263_v61 = vadd.f32 %v4262_v60, %v4261_v56  ;;  %v3418_v62 = vadd.f32 %v4241_v59, %v3377_v48  ;;  %v3456_v63 = vadd.f32 %v4260_v55, %v3415_v58 }
 0x3af   : > { %v3459_v1 = vadd.f32 %v4263_v61, %v3418_v62 }
 0x3b9   : > { %v3578_v2 = vpop.f32.mrb[36].mxu0 }
 0x3ba   : > { %v4364_v3 = vpop.f32.mrb[37].mxu0  ;;  %v3579_v7 = vadd.f32 %v3963_v6, %v3578_v2 }
 0x3bb   : > { %v3581_v4 = vpop.f32.mrb[38].mxu0 }
 0x3bc   : > { %v4365_v5 = vpop.f32.mrb[39].mxu0  ;;  %v3585_v9 = vmax.f32 %v3579_v7, 0.0  ;;  %v3582_v10 = vadd.f32 %v3963_v6, %v3581_v4 }
 0x3be   : > { %v3586_v35 = vmax.f32 %v3582_v10, 0.0 }
 0x3c7   : > { %v3496_v8 = vpop.f32.mrb[28].mxu1 }
 0x3c8   : > { %v3497_v11 = vadd.f32 %v3496_v8, %v3456_v63  ;;  %v4352_v12 = vpop.f32.mrb[29].mxu1 }
 0x3c9   : > { %v3499_v13 = vpop.f32.mrb[30].mxu1 }
 0x3ca   : > { %v3503_v0 = vmax.f32 %v3497_v11, 0.0  ;;  %v3500_v14 = vadd.f32 %v3499_v13, %v3459_v1  ;;  %v4353_v15 = vpop.f32.mrb[31].mxu1 }
 0x3cc   : > { %v3587_v16 = vadd.f32 %v3585_v9, %v3503_v0  ;;  %v3504_v17 = vmax.f32 %v3500_v14, 0.0 }
 0x3ce   : > { %3589 = vst [vmem:[%s510_s16] sm:$0xff] %v3587_v16  ;;  %v3588_v18 = vadd.f32 %v3586_v35, %v3504_v17 }
 0x3d0   : > { %3590 = vst [vmem:[%s510_s16 + $0x8] sm:$0xff] %v3588_v18 }
 0x3d1 PF: > { %s5068_s29 = sld [smem:[#allocation12_spill]] }
 0x3d7   : > { %s27_s29 = sadd.s32 1, %s5068_s29  }
 0x3d8   : > { %p24_p5 = scmp.ge.s32.totalorder %s27_s29, 4  }
 0x3da   :  { %26 = sbr.rel (!%p24_p5) target bundleno = 2 (0x2), region = 123 }
 0x3e1   :  { %3628 = vsyncpa [#allocation7], 1 }
 0x3e2   :  { %3630 = vsyncpa [#allocation7 + $0x1], 1 }
 0x3e3   :  { %3631 = vsyncpa [#allocation9], 1 }

</bundles_post_ra>
